<compile_context>
chip_gen: v7x
topology: tpu7x:2x2x1
jax: 0.10.0
libtpu: 0.0.40
codegen_flags: <defaults>
</compile_context>

<pallas_src>
import functools
import math

import jax
import jax.numpy as jnp
from jax import lax
from jax.experimental import pallas as pl
from jax.experimental.pallas import tpu as pltpu


# ----------------------------------------------------------------------------- kernel
def _fused_layer_norm(z, gamma, beta, eps):
    # mean and mean-of-squares computed together (single pass over z)
    mu = jnp.mean(z, axis=-1, keepdims=True)
    ms = jnp.mean(z * z, axis=-1, keepdims=True)
    var = jnp.maximum(ms - mu * mu, 0.0)
    return (z - mu) * lax.rsqrt(var + eps) * gamma + beta


def transformer_ts_kernel(
    x_ref, cond_ref,
    wqkv_ref, wo_ref, w1_ref, w2_ref, vec_ref,
    out_ref,
    h_ref,                                   # VMEM scratch: carried activations (BB*L, D)
    *, n_heads, eps, batch_block, seq_len,
):
    l = pl.program_id(1)
    n_layers = pl.num_programs(1)
    BB, L, H = batch_block, seq_len, n_heads
    D = x_ref.shape[-1]
    N = BB * L
    E = D // H
    scale = 1.0 / math.sqrt(E)
    bf16 = jnp.bfloat16
    f32 = jnp.float32

    # ---- layer 0: embeds = x + ContinuousTemporalEmbedding(time), carried in scratch ----
    @pl.when(l == 0)
    def _():
        h_ref[...] = (x_ref[...] + cond_ref[:, 0:1, :]).reshape(N, D)

    h = h_ref[...]                                       # (N, D) fp32

    # ---- packed per-layer bias / LayerNorm vectors: one DMA, sublane slices ----
    vec = vec_ref[0]                                     # (10, D)
    bq, bk, bv = vec[0:1], vec[1:2], vec[2:3]
    bo, b1, b2 = vec[3:4], vec[4:5], vec[5:6]
    g1, be1 = vec[6:7], vec[7:8]
    g2, be2 = vec[8:9], vec[9:10]

    # ---- masks (VPU-only, built from iota; no integer division) ----
    # head-selection mask (H, 1, D): pick head hh's E feature columns
    lane = lax.broadcasted_iota(jnp.int32, (H, 1, D), 2)
    hid = lax.broadcasted_iota(jnp.int32, (H, 1, D), 0)
    head_sel = (lane >= hid * E) & (lane < hid * E + E)
    head_mask = head_sel.astype(f32)                     # for concat-of-heads recombination
    q_mask = jnp.where(head_sel, jnp.float32(scale), jnp.float32(0.0))  # fold 1/sqrt(E)

    # same-sample mask for the batched score matrix (H*N, N)
    col = lax.broadcasted_iota(jnp.int32, (H * N, N), 1)                     # key token idx
    rb = lax.broadcasted_iota(jnp.int32, (BB, L, N), 0).reshape(N, N)        # query sample
    rb = jnp.broadcast_to(rb[None], (H, N, N)).reshape(H * N, N)
    lo = rb * L
    same_batch = (col >= lo) & (col < lo + L)

    # ---- fused QKV projection: one MXU push for the whole batch block ----
    qkv = jnp.dot(h.astype(bf16), wqkv_ref[0], preferred_element_type=f32)   # (N, 3D)
    q = qkv[:, :D] + bq
    k = qkv[:, D:2 * D] + bk
    v = qkv[:, 2 * D:] + bv

    # ---- attention: all heads x all samples in one score matmul / softmax / p@v ----
    qm = (q[None, :, :] * q_mask).reshape(H * N, D)      # head-masked & pre-scaled q
    nt_dims = (((1,), (1,)), ((), ()))                   # contract last dims (A @ B.T)
    s = lax.dot_general(qm.astype(bf16), k.astype(bf16), nt_dims,
                        preferred_element_type=f32)      # (H*N, N)
    s = jnp.where(same_batch, s, jnp.float32(-1e30))     # kill cross-sample attention
    s = s - jnp.max(s, axis=-1, keepdims=True)
    p = jnp.exp(s)
    p = p * pl.reciprocal(jnp.sum(p, axis=-1, keepdims=True), approx=True)
    o = jnp.dot(p.astype(bf16), v.astype(bf16),
                preferred_element_type=f32)              # (H*N, D)
    # keep head-hh columns of head-hh's row block and sum -> concat(heads): (N, D)
    attn_cat = jnp.sum(o.reshape(H, N, D) * head_mask, axis=0)

    # ---- single output projection for the whole batch block ----
    attn = jnp.dot(attn_cat.astype(bf16), wo_ref[0], preferred_element_type=f32) + bo

    # ---- EncoderLayer: residual + norm1 + FFN (Conv1d k=1 == Linear) + residual + norm2 ----
    x1 = _fused_layer_norm(h + attn, g1, be1, eps)
    y = jnp.dot(x1.astype(bf16), w1_ref[0], preferred_element_type=f32) + b1
    y = jnp.maximum(y, 0.0)
    y = jnp.dot(y.astype(bf16), w2_ref[0], preferred_element_type=f32) + b2
    h_ref[...] = _fused_layer_norm(x1 + y, g2, be2, eps)

    # ---- after last layer: ConditionalLayerNorm (affine-free LN + FiLM(time)) ----
    @pl.when(l == n_layers - 1)
    def _():
        hf = h_ref[...]
        mu = jnp.mean(hf, axis=-1, keepdims=True)
        ms = jnp.mean(hf * hf, axis=-1, keepdims=True)
        var = jnp.maximum(ms - mu * mu, 0.0)
        hn = ((hf - mu) * lax.rsqrt(var + eps)).reshape(BB, L, D)
        out_ref[...] = hn * (1.0 + cond_ref[:, 1:2, :]) + cond_ref[:, 2:3, :]


# ----------------------------------------------------------------------------- glue
def _time_conditioning(params, time, D):
    """Sinusoidal embedding of continuous time + FiLM scale/shift (tiny, pure-JAX glue)."""
    B = time.shape[0]
    idx = jnp.arange(0, D, 2, dtype=jnp.float32)
    div = jnp.exp(idx * (-math.log(10000.0) / D))
    ang = time[:, None] * div[None, :]                                   # (B, D/2)
    temb = jnp.stack([jnp.sin(ang), jnp.cos(ang)], axis=-1).reshape(B, D)
    temb = temb[:, None, :]                                              # (B, 1, D)
    film = time[:, None] @ params["w_film"] + params["b_film"]           # (B, 2D)
    fscale = film[:, None, :D]
    fshift = film[:, None, D:]
    return temb, fscale, fshift


def transformer_ts_forward(params, x, time, *, n_heads, batch_block=None, eps=1e-5):
    B, L, D = x.shape
    if batch_block is None:
        # keep the parallel grid axis at extent >= 2 so both v7x TensorCores get work
        batch_block = max(1, B // 2) if B >= 2 else 1
    assert B % batch_block == 0
    nb = B // batch_block

    temb, fscale, fshift = _time_conditioning(params, time, D)
    cond = jnp.concatenate([temb, fscale, fshift], axis=1)               # (B, 3, D)

    bf16 = jnp.bfloat16
    wqkv = jnp.concatenate([params["wq"], params["wk"], params["wv"]], axis=-1).astype(bf16)
    wo = params["wo"].astype(bf16)
    w1 = params["w1"].astype(bf16)
    w2 = params["w2"].astype(bf16)
    d_ff = w1.shape[-1]
    # EncoderLayer is constructed with d_ff == embed_dim in TransformerTS
    assert d_ff == D, "bias/LN vector packing assumes d_ff == embed_dim"
    # pack all per-layer (1, D) vectors into one array: 1 DMA per layer instead of 8
    vecs = jnp.concatenate(
        [params["bq"], params["bk"], params["bv"], params["bo"],
         params["b1"], params["b2"], params["g1"], params["be1"],
         params["g2"], params["be2"]], axis=1)                           # (n_layers, 10, D)
    n_layers = wqkv.shape[0]

    def wspec(arr):
        shp = arr.shape
        return pl.BlockSpec((1,) + tuple(shp[1:]), lambda b, l: (l, 0, 0))

    kernel = functools.partial(
        transformer_ts_kernel, n_heads=n_heads, eps=eps,
        batch_block=batch_block, seq_len=L)

    # VMEM budget: double-buffered per-layer weights + activation blocks + slack
    w_bytes = sum(int(a.size // a.shape[0]) * a.dtype.itemsize
                  for a in (wqkv, wo, w1, w2, vecs))
    act_bytes = batch_block * L * D * 4
    vmem_limit = int(min(max(2 * w_bytes + 8 * act_bytes + (1 << 20), 32 << 20), 64 << 20))

    return pl.pallas_call(
        kernel,
        out_shape=jax.ShapeDtypeStruct((B, L, D), jnp.float32),
        grid=(nb, n_layers),
        in_specs=[
            pl.BlockSpec((batch_block, L, D), lambda b, l: (b, 0, 0)),   # x
            pl.BlockSpec((batch_block, 3, D), lambda b, l: (b, 0, 0)),   # temb / FiLM scale / shift
            wspec(wqkv), wspec(wo), wspec(w1), wspec(w2), wspec(vecs),
        ],
        out_specs=pl.BlockSpec((batch_block, L, D), lambda b, l: (b, 0, 0)),
        scratch_shapes=[pltpu.VMEM((batch_block * L, D), jnp.float32)],
        compiler_params=pltpu.CompilerParams(
            dimension_semantics=("parallel", "arbitrary"),
            vmem_limit_bytes=vmem_limit),
    )(x, cond, wqkv, wo, w1, w2, vecs)


# ----------------------------------------------------------------------------- params
def init_params(key, n_layers, D, d_ff):
    ks = jax.random.split(key, 16)
    w = lambda k, shape: (0.02 * jax.random.normal(k, shape)).astype(jnp.float32)
    return {
        "wq": w(ks[0], (n_layers, D, D)), "bq": w(ks[1], (n_layers, 1, D)),
        "wk": w(ks[2], (n_layers, D, D)), "bk": w(ks[3], (n_layers, 1, D)),
        "wv": w(ks[4], (n_layers, D, D)), "bv": w(ks[5], (n_layers, 1, D)),
        "wo": w(ks[6], (n_layers, D, D)), "bo": w(ks[7], (n_layers, 1, D)),
        "w1": w(ks[8], (n_layers, D, d_ff)), "b1": w(ks[9], (n_layers, 1, d_ff)),
        "w2": w(ks[10], (n_layers, d_ff, D)), "b2": w(ks[11], (n_layers, 1, D)),
        "g1": jnp.ones((n_layers, 1, D), jnp.float32),
        "be1": jnp.zeros((n_layers, 1, D), jnp.float32),
        "g2": jnp.ones((n_layers, 1, D), jnp.float32),
        "be2": jnp.zeros((n_layers, 1, D), jnp.float32),
        "w_film": w(ks[12], (1, 2 * D)),
        "b_film": jnp.zeros((2 * D,), jnp.float32),
    }


# ----------------------------------------------------------------------------- pure-JAX reference
def _round_matmul_weights(params):
    """Reference uses the same bf16-rounded matmul weights the kernel sees."""
    r = dict(params)
    for n in ("wq", "wk", "wv", "wo", "w1", "w2"):
        r[n] = params[n].astype(jnp.bfloat16).astype(jnp.float32)
    return r


def _ref_single(params, n_heads, x, temb, fscale, fshift, eps=1e-5):
    L, D = x.shape
    E = D // n_heads
    n_layers = params["wq"].shape[0]

    def ln(z, g, b):
        mu = z.mean(-1, keepdims=True)
        var = ((z - mu) ** 2).mean(-1, keepdims=True)
        return (z - mu) / jnp.sqrt(var + eps) * g + b

    h = x + temb
    for l in range(n_layers):
        q = h @ params["wq"][l] + params["bq"][l]
        k = h @ params["wk"][l] + params["bk"][l]
        v = h @ params["wv"][l] + params["bv"][l]
        qh, kh, vh = (t.reshape(L, n_heads, E) for t in (q, k, v))
        scores = jnp.einsum("lhe,she->hls", qh, kh) / math.sqrt(E)
        A = jax.nn.softmax(scores, axis=-1)
        o = jnp.einsum("hls,shd->lhd", A, vh).reshape(L, D)
        attn = o @ params["wo"][l] + params["bo"][l]
        x1 = ln(h + attn, params["g1"][l], params["be1"][l])
        y = jax.nn.relu(x1 @ params["w1"][l] + params["b1"][l])
        y = y @ params["w2"][l] + params["b2"][l]
        h = ln(x1 + y, params["g2"][l], params["be2"][l])
    mu = h.mean(-1, keepdims=True)
    var = ((h - mu) ** 2).mean(-1, keepdims=True)
    hn = (h - mu) / jnp.sqrt(var + eps)
    return hn * (1.0 + fscale) + fshift


def reference_forward(params, x, time, *, n_heads):
    B, L, D = x.shape
    rparams = _round_matmul_weights(params)
    temb, fscale, fshift = _time_conditioning(rparams, time, D)
    fn = functools.partial(_ref_single, rparams, n_heads)
    return jax.vmap(fn)(x, temb, fscale, fshift)


# ----------------------------------------------------------------------------- main
if __name__ == "__main__":
    # configs: num_residual_layers=2, num_res_attn_heads=4, hidden_dropout_prob=0.0
    B, L, D, H, NL = 4, 8, 32, 4, 2

    key = jax.random.PRNGKey(0)
    kx, kt, kp = jax.random.split(key, 3)
    x = jax.random.normal(kx, (B, L, D), dtype=jnp.float32)
    time = jax.random.uniform(kt, (B,), dtype=jnp.float32)
    params = init_params(kp, NL, D, D)

    out = transformer_ts_forward(params, x, time, n_heads=H)
    out = jax.block_until_ready(out)
    assert out.shape == (B, L, D)

    ref = reference_forward(params, x, time, n_heads=H)
    max_err = float(jnp.max(jnp.abs(out - ref)))
    # bf16 matmul operands + approx-reciprocal softmax => looser tolerance than pure fp32
    if not (max_err < 3e-2):
        raise AssertionError(f"Pallas kernel mismatch vs reference: max_err={max_err}")

    print("KERNEL_OK")
</pallas_src>

<mosaic_0001>
module attributes {stable_mosaic.version = 11 : i64} {
  func.func @transformer_ts_kernel(%arg0: i32, %arg1: i32, %arg2: memref<2x8x32xf32, #tpu.memory_space<vmem>>, %arg3: memref<2x3x32xf32, #tpu.memory_space<vmem>>, %arg4: memref<1x32x96xbf16, #tpu.memory_space<vmem>>, %arg5: memref<1x32x32xbf16, #tpu.memory_space<vmem>>, %arg6: memref<1x32x32xbf16, #tpu.memory_space<vmem>>, %arg7: memref<1x32x32xbf16, #tpu.memory_space<vmem>>, %arg8: memref<1x10x32xf32, #tpu.memory_space<vmem>>, %arg9: memref<2x8x32xf32, #tpu.memory_space<vmem>>, %arg10: memref<16x32xf32, #tpu.memory_space<vmem>>) attributes {dimension_semantics = [#tpu.dimension_semantics<parallel>, #tpu.dimension_semantics<arbitrary>], iteration_bounds = array<i64: 2, 2>, scalar_prefetch = 0 : i64, scratch_operands = 1 : i64, tpu.core_type = #tpu.core_type<tc>, window_params = [{transform_indices = @transform_0, window_bounds = array<i64: 2, 8, 32>}, {transform_indices = @transform_1, window_bounds = array<i64: 2, 3, 32>}, {transform_indices = @transform_2, window_bounds = array<i64: 1, 32, 96>}, {transform_indices = @transform_3, window_bounds = array<i64: 1, 32, 32>}, {transform_indices = @transform_4, window_bounds = array<i64: 1, 32, 32>}, {transform_indices = @transform_5, window_bounds = array<i64: 1, 32, 32>}, {transform_indices = @transform_6, window_bounds = array<i64: 1, 10, 32>}, {transform_indices = @transform_7, window_bounds = array<i64: 2, 8, 32>}]} {
    %c0_i32 = arith.constant 0 : i32
    %0 = arith.cmpi eq, %arg1, %c0_i32 : i32
    %1 = arith.extui %0 : i1 to i32
    %c0_i32_0 = arith.constant 0 : i32
    %2 = arith.cmpi ne, %1, %c0_i32_0 : i32
    scf.if %2 {
      %c0_48 = arith.constant 0 : index
      %c0_49 = arith.constant 0 : index
      %c0_50 = arith.constant 0 : index
      %160 = vector.load %arg2[%c0_48, %c0_49, %c0_50] : memref<2x8x32xf32, #tpu.memory_space<vmem>>, vector<2x8x32xf32>
      %c0_51 = arith.constant 0 : index
      %c0_52 = arith.constant 0 : index
      %c0_53 = arith.constant 0 : index
      %161 = vector.load %arg3[%c0_51, %c0_52, %c0_53] : memref<2x3x32xf32, #tpu.memory_space<vmem>>, vector<2x1x32xf32>
      %162 = vector.broadcast %161 : vector<2x1x32xf32> to vector<2x8x32xf32>
      %163 = arith.addf %160, %162 : vector<2x8x32xf32>
      %164 = vector.shape_cast %163 : vector<2x8x32xf32> to vector<16x32xf32>
      %c0_54 = arith.constant 0 : index
      %c0_55 = arith.constant 0 : index
      %165 = vector.load %arg10[%c0_54, %c0_55] : memref<16x32xf32, #tpu.memory_space<vmem>>, vector<16x32xf32>
      tpu.vector_store %arg10[%c0_54, %c0_55], %164 {strides = array<i32>} : memref<16x32xf32, #tpu.memory_space<vmem>>, vector<16x32xf32>,
    } else {
    }
    %c0 = arith.constant 0 : index
    %c0_1 = arith.constant 0 : index
    %3 = vector.load %arg10[%c0, %c0_1] : memref<16x32xf32, #tpu.memory_space<vmem>>, vector<16x32xf32>
    %c0_2 = arith.constant 0 : index
    %c0_3 = arith.constant 0 : index
    %c0_4 = arith.constant 0 : index
    %4 = vector.load %arg8[%c0_2, %c0_3, %c0_4] : memref<1x10x32xf32, #tpu.memory_space<vmem>>, vector<1x10x32xf32>
    %5 = vector.shape_cast %4 : vector<1x10x32xf32> to vector<10x32xf32>
    %6 = vector.extract_strided_slice %5 {offsets = [0, 0], sizes = [1, 32], strides = [1, 1]} : vector<10x32xf32> to vector<1x32xf32>
    %7 = vector.extract_strided_slice %5 {offsets = [1, 0], sizes = [1, 32], strides = [1, 1]} : vector<10x32xf32> to vector<1x32xf32>
    %8 = vector.extract_strided_slice %5 {offsets = [2, 0], sizes = [1, 32], strides = [1, 1]} : vector<10x32xf32> to vector<1x32xf32>
    %9 = vector.extract_strided_slice %5 {offsets = [3, 0], sizes = [1, 32], strides = [1, 1]} : vector<10x32xf32> to vector<1x32xf32>
    %10 = vector.extract_strided_slice %5 {offsets = [4, 0], sizes = [1, 32], strides = [1, 1]} : vector<10x32xf32> to vector<1x32xf32>
    %11 = vector.extract_strided_slice %5 {offsets = [5, 0], sizes = [1, 32], strides = [1, 1]} : vector<10x32xf32> to vector<1x32xf32>
    %12 = vector.extract_strided_slice %5 {offsets = [6, 0], sizes = [1, 32], strides = [1, 1]} : vector<10x32xf32> to vector<1x32xf32>
    %13 = vector.extract_strided_slice %5 {offsets = [7, 0], sizes = [1, 32], strides = [1, 1]} : vector<10x32xf32> to vector<1x32xf32>
    %14 = vector.extract_strided_slice %5 {offsets = [8, 0], sizes = [1, 32], strides = [1, 1]} : vector<10x32xf32> to vector<1x32xf32>
    %15 = vector.extract_strided_slice %5 {offsets = [9, 0], sizes = [1, 32], strides = [1, 1]} : vector<10x32xf32> to vector<1x32xf32>
    %16 = tpu.iota {dimensions = array<i32: 2>} : vector<4x1x32xi32>
    %17 = tpu.iota {dimensions = array<i32: 0>} : vector<4x1x32xi32>
    %c8_i32 = arith.constant 8 : i32
    %18 = vector.broadcast %c8_i32 : i32 to vector<4x1x32xi32>
    %19 = arith.muli %17, %18 : vector<4x1x32xi32>
    %20 = arith.cmpi sge, %16, %19 : vector<4x1x32xi32>
    %c8_i32_5 = arith.constant 8 : i32
    %21 = vector.broadcast %c8_i32_5 : i32 to vector<4x1x32xi32>
    %22 = arith.muli %17, %21 : vector<4x1x32xi32>
    %c8_i32_6 = arith.constant 8 : i32
    %23 = vector.broadcast %c8_i32_6 : i32 to vector<4x1x32xi32>
    %24 = arith.addi %22, %23 : vector<4x1x32xi32>
    %25 = arith.cmpi slt, %16, %24 : vector<4x1x32xi32>
    %26 = arith.andi %20, %25 : vector<4x1x32xi1>
    %27 = arith.extui %26 : vector<4x1x32xi1> to vector<4x1x32xi32>
    %28 = arith.sitofp %27 : vector<4x1x32xi32> to vector<4x1x32xf32>
    %cst = arith.constant 0.353553385 : f32
    %cst_7 = arith.constant 0.000000e+00 : f32
    %29 = vector.broadcast %cst : f32 to vector<4x1x32xf32>
    %30 = vector.broadcast %cst_7 : f32 to vector<4x1x32xf32>
    %31 = arith.select %26, %29, %30 : vector<4x1x32xi1>, vector<4x1x32xf32>
    %32 = tpu.iota {dimensions = array<i32: 1>} : vector<64x16xi32>
    %33 = tpu.iota {dimensions = array<i32: 0>} : vector<2x8x16xi32>
    %34 = vector.shape_cast %33 : vector<2x8x16xi32> to vector<16x16xi32>
    %35 = vector.shape_cast %34 : vector<16x16xi32> to vector<1x16x16xi32>
    %36 = vector.shape_cast %35 : vector<1x16x16xi32> to vector<1x16x16xi32>
    %37 = vector.broadcast %36 : vector<1x16x16xi32> to vector<4x16x16xi32>
    %38 = vector.shape_cast %37 : vector<4x16x16xi32> to vector<64x16xi32>
    %c8_i32_8 = arith.constant 8 : i32
    %39 = vector.broadcast %c8_i32_8 : i32 to vector<64x16xi32>
    %40 = arith.muli %38, %39 : vector<64x16xi32>
    %41 = arith.cmpi sge, %32, %40 : vector<64x16xi32>
    %c8_i32_9 = arith.constant 8 : i32
    %42 = vector.broadcast %c8_i32_9 : i32 to vector<64x16xi32>
    %43 = arith.addi %40, %42 : vector<64x16xi32>
    %44 = arith.cmpi slt, %32, %43 : vector<64x16xi32>
    %45 = arith.andi %41, %44 : vector<64x16xi1>
    %46 = arith.truncf %3 : vector<16x32xf32> to vector<16x32xbf16>
    %c0_10 = arith.constant 0 : index
    %c0_11 = arith.constant 0 : index
    %c0_12 = arith.constant 0 : index
    %47 = vector.load %arg4[%c0_10, %c0_11, %c0_12] : memref<1x32x96xbf16, #tpu.memory_space<vmem>>, vector<1x32x96xbf16>
    %48 = vector.shape_cast %47 : vector<1x32x96xbf16> to vector<32x96xbf16>
    %cst_13 = arith.constant dense<0.000000e+00> : vector<16x96xf32>
    %49 = tpu.matmul %46, %48, %cst_13 {dimension_numbers = #tpu.dot_dimension_numbers<[1], [0], [0], [1], [0, 0, 1, 1], [], []>} : vector<16x32xbf16>, vector<32x96xbf16>, vector<16x96xf32> -> vector<16x96xf32>
    %50 = vector.extract_strided_slice %49 {offsets = [0, 0], sizes = [16, 32], strides = [1, 1]} : vector<16x96xf32> to vector<16x32xf32>
    %51 = vector.broadcast %6 : vector<1x32xf32> to vector<16x32xf32>
    %52 = arith.addf %50, %51 : vector<16x32xf32>
    %53 = vector.extract_strided_slice %49 {offsets = [0, 32], sizes = [16, 32], strides = [1, 1]} : vector<16x96xf32> to vector<16x32xf32>
    %54 = vector.broadcast %7 : vector<1x32xf32> to vector<16x32xf32>
    %55 = arith.addf %53, %54 : vector<16x32xf32>
    %56 = vector.extract_strided_slice %49 {offsets = [0, 64], sizes = [16, 32], strides = [1, 1]} : vector<16x96xf32> to vector<16x32xf32>
    %57 = vector.broadcast %8 : vector<1x32xf32> to vector<16x32xf32>
    %58 = arith.addf %56, %57 : vector<16x32xf32>
    %59 = vector.shape_cast %52 : vector<16x32xf32> to vector<1x16x32xf32>
    %60 = vector.broadcast %59 : vector<1x16x32xf32> to vector<4x16x32xf32>
    %61 = vector.broadcast %31 : vector<4x1x32xf32> to vector<4x16x32xf32>
    %62 = arith.mulf %60, %61 : vector<4x16x32xf32>
    %63 = vector.shape_cast %62 : vector<4x16x32xf32> to vector<64x32xf32>
    %64 = arith.truncf %63 : vector<64x32xf32> to vector<64x32xbf16>
    %65 = arith.truncf %55 : vector<16x32xf32> to vector<16x32xbf16>
    %cst_14 = arith.constant dense<0.000000e+00> : vector<64x16xf32>
    %66 = tpu.matmul %64, %65, %cst_14 {dimension_numbers = #tpu.dot_dimension_numbers<[1], [1], [0], [0], [0, 0, 1, 0], [], []>} : vector<64x32xbf16>, vector<16x32xbf16>, vector<64x16xf32> -> vector<64x16xf32>
    %cst_15 = arith.constant -1.000000e+30 : f32
    %67 = vector.broadcast %cst_15 : f32 to vector<64x16xf32>
    %68 = arith.select %45, %66, %67 : vector<64x16xi1>, vector<64x16xf32>
    %cst_16 = arith.constant dense<0xFF800000> : vector<64xf32>
    %69 = vector.multi_reduction <maximumf>, %68, %cst_16 [1] : vector<64x16xf32> to vector<64xf32>
    %70 = vector.shape_cast %69 : vector<64xf32> to vector<64x1xf32>
    %71 = vector.broadcast %70 : vector<64x1xf32> to vector<64x16xf32>
    %72 = arith.subf %68, %71 : vector<64x16xf32>
    %73 = math.exp %72 : vector<64x16xf32>
    %cst_17 = arith.constant dense<0.000000e+00> : vector<64xf32>
    %74 = vector.multi_reduction <add>, %73, %cst_17 [1] : vector<64x16xf32> to vector<64xf32>
    %75 = vector.shape_cast %74 : vector<64xf32> to vector<64x1xf32>
    %76 = tpu.reciprocal %75 {approx = true} : vector<64x1xf32> -> vector<64x1xf32>
    %77 = vector.broadcast %76 : vector<64x1xf32> to vector<64x16xf32>
    %78 = arith.mulf %73, %77 : vector<64x16xf32>
    %79 = arith.truncf %78 : vector<64x16xf32> to vector<64x16xbf16>
    %80 = arith.truncf %58 : vector<16x32xf32> to vector<16x32xbf16>
    %cst_18 = arith.constant dense<0.000000e+00> : vector<64x32xf32>
    %81 = tpu.matmul %79, %80, %cst_18 {dimension_numbers = #tpu.dot_dimension_numbers<[1], [0], [0], [1], [0, 0, 1, 1], [], []>} : vector<64x16xbf16>, vector<16x32xbf16>, vector<64x32xf32> -> vector<64x32xf32>
    %82 = vector.shape_cast %81 : vector<64x32xf32> to vector<4x16x32xf32>
    %83 = vector.broadcast %28 : vector<4x1x32xf32> to vector<4x16x32xf32>
    %84 = arith.mulf %82, %83 : vector<4x16x32xf32>
    %cst_19 = arith.constant dense<0.000000e+00> : vector<16x32xf32>
    %85 = vector.multi_reduction <add>, %84, %cst_19 [0] : vector<4x16x32xf32> to vector<16x32xf32>
    %86 = arith.truncf %85 : vector<16x32xf32> to vector<16x32xbf16>
    %c0_20 = arith.constant 0 : index
    %c0_21 = arith.constant 0 : index
    %c0_22 = arith.constant 0 : index
    %87 = vector.load %arg5[%c0_20, %c0_21, %c0_22] : memref<1x32x32xbf16, #tpu.memory_space<vmem>>, vector<1x32x32xbf16>
    %88 = vector.shape_cast %87 : vector<1x32x32xbf16> to vector<32x32xbf16>
    %cst_23 = arith.constant dense<0.000000e+00> : vector<16x32xf32>
    %89 = tpu.matmul %86, %88, %cst_23 {dimension_numbers = #tpu.dot_dimension_numbers<[1], [0], [0], [1], [0, 0, 1, 1], [], []>} : vector<16x32xbf16>, vector<32x32xbf16>, vector<16x32xf32> -> vector<16x32xf32>
    %90 = vector.broadcast %9 : vector<1x32xf32> to vector<16x32xf32>
    %91 = arith.addf %89, %90 : vector<16x32xf32>
    %92 = arith.addf %3, %91 : vector<16x32xf32>
    %cst_24 = arith.constant dense<0.000000e+00> : vector<16xf32>
    %93 = vector.multi_reduction <add>, %92, %cst_24 [1] : vector<16x32xf32> to vector<16xf32>
    %94 = vector.shape_cast %93 : vector<16xf32> to vector<16x1xf32>
    %cst_25 = arith.constant 3.200000e+01 : f32
    %95 = vector.broadcast %cst_25 : f32 to vector<16x1xf32>
    %96 = arith.divf %94, %95 : vector<16x1xf32>
    %97 = arith.mulf %92, %92 : vector<16x32xf32>
    %cst_26 = arith.constant dense<0.000000e+00> : vector<16xf32>
    %98 = vector.multi_reduction <add>, %97, %cst_26 [1] : vector<16x32xf32> to vector<16xf32>
    %99 = vector.shape_cast %98 : vector<16xf32> to vector<16x1xf32>
    %cst_27 = arith.constant 3.200000e+01 : f32
    %100 = vector.broadcast %cst_27 : f32 to vector<16x1xf32>
    %101 = arith.divf %99, %100 : vector<16x1xf32>
    %102 = arith.mulf %96, %96 : vector<16x1xf32>
    %103 = arith.subf %101, %102 : vector<16x1xf32>
    %cst_28 = arith.constant 0.000000e+00 : f32
    %104 = vector.broadcast %cst_28 : f32 to vector<16x1xf32>
    %105 = arith.maximumf %103, %104 : vector<16x1xf32>
    %106 = vector.broadcast %96 : vector<16x1xf32> to vector<16x32xf32>
    %107 = arith.subf %92, %106 : vector<16x32xf32>
    %cst_29 = arith.constant 9.99999974E-6 : f32
    %108 = vector.broadcast %cst_29 : f32 to vector<16x1xf32>
    %109 = arith.addf %105, %108 : vector<16x1xf32>
    %110 = math.rsqrt %109 : vector<16x1xf32>
    %111 = vector.broadcast %110 : vector<16x1xf32> to vector<16x32xf32>
    %112 = arith.mulf %107, %111 : vector<16x32xf32>
    %113 = vector.broadcast %12 : vector<1x32xf32> to vector<16x32xf32>
    %114 = arith.mulf %112, %113 : vector<16x32xf32>
    %115 = vector.broadcast %13 : vector<1x32xf32> to vector<16x32xf32>
    %116 = arith.addf %114, %115 : vector<16x32xf32>
    %117 = arith.truncf %116 : vector<16x32xf32> to vector<16x32xbf16>
    %c0_30 = arith.constant 0 : index
    %c0_31 = arith.constant 0 : index
    %c0_32 = arith.constant 0 : index
    %118 = vector.load %arg6[%c0_30, %c0_31, %c0_32] : memref<1x32x32xbf16, #tpu.memory_space<vmem>>, vector<1x32x32xbf16>
    %119 = vector.shape_cast %118 : vector<1x32x32xbf16> to vector<32x32xbf16>
    %cst_33 = arith.constant dense<0.000000e+00> : vector<16x32xf32>
    %120 = tpu.matmul %117, %119, %cst_33 {dimension_numbers = #tpu.dot_dimension_numbers<[1], [0], [0], [1], [0, 0, 1, 1], [], []>} : vector<16x32xbf16>, vector<32x32xbf16>, vector<16x32xf32> -> vector<16x32xf32>
    %121 = vector.broadcast %10 : vector<1x32xf32> to vector<16x32xf32>
    %122 = arith.addf %120, %121 : vector<16x32xf32>
    %cst_34 = arith.constant 0.000000e+00 : f32
    %123 = vector.broadcast %cst_34 : f32 to vector<16x32xf32>
    %124 = arith.maximumf %122, %123 : vector<16x32xf32>
    %125 = arith.truncf %124 : vector<16x32xf32> to vector<16x32xbf16>
    %c0_35 = arith.constant 0 : index
    %c0_36 = arith.constant 0 : index
    %c0_37 = arith.constant 0 : index
    %126 = vector.load %arg7[%c0_35, %c0_36, %c0_37] : memref<1x32x32xbf16, #tpu.memory_space<vmem>>, vector<1x32x32xbf16>
    %127 = vector.shape_cast %126 : vector<1x32x32xbf16> to vector<32x32xbf16>
    %cst_38 = arith.constant dense<0.000000e+00> : vector<16x32xf32>
    %128 = tpu.matmul %125, %127, %cst_38 {dimension_numbers = #tpu.dot_dimension_numbers<[1], [0], [0], [1], [0, 0, 1, 1], [], []>} : vector<16x32xbf16>, vector<32x32xbf16>, vector<16x32xf32> -> vector<16x32xf32>
    %129 = vector.broadcast %11 : vector<1x32xf32> to vector<16x32xf32>
    %130 = arith.addf %128, %129 : vector<16x32xf32>
    %131 = arith.addf %116, %130 : vector<16x32xf32>
    %cst_39 = arith.constant dense<0.000000e+00> : vector<16xf32>
    %132 = vector.multi_reduction <add>, %131, %cst_39 [1] : vector<16x32xf32> to vector<16xf32>
    %133 = vector.shape_cast %132 : vector<16xf32> to vector<16x1xf32>
    %cst_40 = arith.constant 3.200000e+01 : f32
    %134 = vector.broadcast %cst_40 : f32 to vector<16x1xf32>
    %135 = arith.divf %133, %134 : vector<16x1xf32>
    %136 = arith.mulf %131, %131 : vector<16x32xf32>
    %cst_41 = arith.constant dense<0.000000e+00> : vector<16xf32>
    %137 = vector.multi_reduction <add>, %136, %cst_41 [1] : vector<16x32xf32> to vector<16xf32>
    %138 = vector.shape_cast %137 : vector<16xf32> to vector<16x1xf32>
    %cst_42 = arith.constant 3.200000e+01 : f32
    %139 = vector.broadcast %cst_42 : f32 to vector<16x1xf32>
    %140 = arith.divf %138, %139 : vector<16x1xf32>
    %141 = arith.mulf %135, %135 : vector<16x1xf32>
    %142 = arith.subf %140, %141 : vector<16x1xf32>
    %cst_43 = arith.constant 0.000000e+00 : f32
    %143 = vector.broadcast %cst_43 : f32 to vector<16x1xf32>
    %144 = arith.maximumf %142, %143 : vector<16x1xf32>
    %145 = vector.broadcast %135 : vector<16x1xf32> to vector<16x32xf32>
    %146 = arith.subf %131, %145 : vector<16x32xf32>
    %cst_44 = arith.constant 9.99999974E-6 : f32
    %147 = vector.broadcast %cst_44 : f32 to vector<16x1xf32>
    %148 = arith.addf %144, %147 : vector<16x1xf32>
    %149 = math.rsqrt %148 : vector<16x1xf32>
    %150 = vector.broadcast %149 : vector<16x1xf32> to vector<16x32xf32>
    %151 = arith.mulf %146, %150 : vector<16x32xf32>
    %152 = vector.broadcast %14 : vector<1x32xf32> to vector<16x32xf32>
    %153 = arith.mulf %151, %152 : vector<16x32xf32>
    %154 = vector.broadcast %15 : vector<1x32xf32> to vector<16x32xf32>
    %155 = arith.addf %153, %154 : vector<16x32xf32>
    %c0_45 = arith.constant 0 : index
    %c0_46 = arith.constant 0 : index
    %156 = vector.load %arg10[%c0_45, %c0_46] : memref<16x32xf32, #tpu.memory_space<vmem>>, vector<16x32xf32>
    tpu.vector_store %arg10[%c0_45, %c0_46], %155 {strides = array<i32>} : memref<16x32xf32, #tpu.memory_space<vmem>>, vector<16x32xf32>,
    %c1_i32 = arith.constant 1 : i32
    %157 = arith.cmpi eq, %arg1, %c1_i32 : i32
    %158 = arith.extui %157 : i1 to i32
    %c0_i32_47 = arith.constant 0 : i32
    %159 = arith.cmpi ne, %158, %c0_i32_47 : i32
    scf.if %159 {
      %c0_48 = arith.constant 0 : index
      %c0_49 = arith.constant 0 : index
      %160 = vector.load %arg10[%c0_48, %c0_49] : memref<16x32xf32, #tpu.memory_space<vmem>>, vector<16x32xf32>
      %cst_50 = arith.constant dense<0.000000e+00> : vector<16xf32>
      %161 = vector.multi_reduction <add>, %160, %cst_50 [1] : vector<16x32xf32> to vector<16xf32>
      %162 = vector.shape_cast %161 : vector<16xf32> to vector<16x1xf32>
      %cst_51 = arith.constant 3.200000e+01 : f32
      %163 = vector.broadcast %cst_51 : f32 to vector<16x1xf32>
      %164 = arith.divf %162, %163 : vector<16x1xf32>
      %165 = arith.mulf %160, %160 : vector<16x32xf32>
      %cst_52 = arith.constant dense<0.000000e+00> : vector<16xf32>
      %166 = vector.multi_reduction <add>, %165, %cst_52 [1] : vector<16x32xf32> to vector<16xf32>
      %167 = vector.shape_cast %166 : vector<16xf32> to vector<16x1xf32>
      %cst_53 = arith.constant 3.200000e+01 : f32
      %168 = vector.broadcast %cst_53 : f32 to vector<16x1xf32>
      %169 = arith.divf %167, %168 : vector<16x1xf32>
      %170 = arith.mulf %164, %164 : vector<16x1xf32>
      %171 = arith.subf %169, %170 : vector<16x1xf32>
      %cst_54 = arith.constant 0.000000e+00 : f32
      %172 = vector.broadcast %cst_54 : f32 to vector<16x1xf32>
      %173 = arith.maximumf %171, %172 : vector<16x1xf32>
      %174 = vector.broadcast %164 : vector<16x1xf32> to vector<16x32xf32>
      %175 = arith.subf %160, %174 : vector<16x32xf32>
      %cst_55 = arith.constant 9.99999974E-6 : f32
      %176 = vector.broadcast %cst_55 : f32 to vector<16x1xf32>
      %177 = arith.addf %173, %176 : vector<16x1xf32>
      %178 = math.rsqrt %177 : vector<16x1xf32>
      %179 = vector.broadcast %178 : vector<16x1xf32> to vector<16x32xf32>
      %180 = arith.mulf %175, %179 : vector<16x32xf32>
      %181 = vector.shape_cast %180 : vector<16x32xf32> to vector<2x8x32xf32>
      %c0_56 = arith.constant 0 : index
      %c1 = arith.constant 1 : index
      %c0_57 = arith.constant 0 : index
      %182 = vector.load %arg3[%c0_56, %c1, %c0_57] : memref<2x3x32xf32, #tpu.memory_space<vmem>>, vector<2x1x32xf32>
      %cst_58 = arith.constant 1.000000e+00 : f32
      %183 = vector.broadcast %cst_58 : f32 to vector<2x1x32xf32>
      %184 = arith.addf %183, %182 : vector<2x1x32xf32>
      %185 = vector.broadcast %184 : vector<2x1x32xf32> to vector<2x8x32xf32>
      %186 = arith.mulf %181, %185 : vector<2x8x32xf32>
      %c0_59 = arith.constant 0 : index
      %c2 = arith.constant 2 : index
      %c0_60 = arith.constant 0 : index
      %187 = vector.load %arg3[%c0_59, %c2, %c0_60] : memref<2x3x32xf32, #tpu.memory_space<vmem>>, vector<2x1x32xf32>
      %188 = vector.broadcast %187 : vector<2x1x32xf32> to vector<2x8x32xf32>
      %189 = arith.addf %186, %188 : vector<2x8x32xf32>
      %c0_61 = arith.constant 0 : index
      %c0_62 = arith.constant 0 : index
      %c0_63 = arith.constant 0 : index
      %190 = vector.load %arg9[%c0_61, %c0_62, %c0_63] : memref<2x8x32xf32, #tpu.memory_space<vmem>>, vector<2x8x32xf32>
      tpu.vector_store %arg9[%c0_61, %c0_62, %c0_63], %189 {strides = array<i32>} : memref<2x8x32xf32, #tpu.memory_space<vmem>>, vector<2x8x32xf32>,
    } else {
    }
    return
  }
  func.func @transform_0(%arg0: i32, %arg1: i32) -> (i32, i32, i32) {
    %c0_i32 = arith.constant 0 : i32
    %c0_i32_0 = arith.constant 0 : i32
    %c0_i32_1 = arith.constant 0 : i32
    return %arg0, %c0_i32, %c0_i32_0 : i32, i32, i32
  }
  func.func @transform_1(%arg0: i32, %arg1: i32) -> (i32, i32, i32) {
    %c0_i32 = arith.constant 0 : i32
    %c0_i32_0 = arith.constant 0 : i32
    %c0_i32_1 = arith.constant 0 : i32
    return %arg0, %c0_i32, %c0_i32_0 : i32, i32, i32
  }
  func.func @transform_2(%arg0: i32, %arg1: i32) -> (i32, i32, i32) {
    %c0_i32 = arith.constant 0 : i32
    %c0_i32_0 = arith.constant 0 : i32
    %c0_i32_1 = arith.constant 0 : i32
    return %arg1, %c0_i32, %c0_i32_0 : i32, i32, i32
  }
  func.func @transform_3(%arg0: i32, %arg1: i32) -> (i32, i32, i32) {
    %c0_i32 = arith.constant 0 : i32
    %c0_i32_0 = arith.constant 0 : i32
    %c0_i32_1 = arith.constant 0 : i32
    return %arg1, %c0_i32, %c0_i32_0 : i32, i32, i32
  }
  func.func @transform_4(%arg0: i32, %arg1: i32) -> (i32, i32, i32) {
    %c0_i32 = arith.constant 0 : i32
    %c0_i32_0 = arith.constant 0 : i32
    %c0_i32_1 = arith.constant 0 : i32
    return %arg1, %c0_i32, %c0_i32_0 : i32, i32, i32
  }
  func.func @transform_5(%arg0: i32, %arg1: i32) -> (i32, i32, i32) {
    %c0_i32 = arith.constant 0 : i32
    %c0_i32_0 = arith.constant 0 : i32
    %c0_i32_1 = arith.constant 0 : i32
    return %arg1, %c0_i32, %c0_i32_0 : i32, i32, i32
  }
  func.func @transform_6(%arg0: i32, %arg1: i32) -> (i32, i32, i32) {
    %c0_i32 = arith.constant 0 : i32
    %c0_i32_0 = arith.constant 0 : i32
    %c0_i32_1 = arith.constant 0 : i32
    return %arg1, %c0_i32, %c0_i32_0 : i32, i32, i32
  }
  func.func @transform_7(%arg0: i32, %arg1: i32) -> (i32, i32, i32) {
    %c0_i32 = arith.constant 0 : i32
    %c0_i32_0 = arith.constant 0 : i32
    %c0_i32_1 = arith.constant 0 : i32
    return %arg0, %c0_i32, %c0_i32_0 : i32, i32, i32
  }
}

</mosaic_0001>

<bundles_post_ra>
// kernel: tpu_custom_call.1
= control target key start
LH: loop header
LB: loop body
LE: loop exit
PB: predicated region body
PF: predicated region fallthrough
CT: control target
= control target key end

     0   :  { %s2499_s0 = inlined_call_operand.vmem [shape: f32[4,8,32], index: 0, kind: input, shape index: {}]   ;;  %s2500_s1 = inlined_call_operand.vmem [shape: f32[4,3,32], index: 1, kind: input, shape index: {}]   ;;  %s2501_s2 = inlined_call_operand.vmem [shape: bf16[2,32,96], index: 2, kind: input, shape index: {}]   ;;  %s2502_s3 = inlined_call_operand.hbm [shape: bf16[2,32,32], index: 3, kind: input, shape index: {}]   ;;  %s2503_s4 = inlined_call_operand.hbm [shape: bf16[2,32,32], index: 4, kind: input, shape index: {}]   ;;  %s2504_s5 = inlined_call_operand.vmem [shape: bf16[2,32,32], index: 5, kind: input, shape index: {}]   ;;  %s2505_s6 = inlined_call_operand.vmem [shape: f32[2,10,32], index: 6, kind: input, shape index: {}]   ;;  %s2506_s7 = inlined_call_operand.hbm [shape: f32[4,8,32], index: 7, kind: output, shape index: {}]  }
   0x1   :  { %2524 = sst [smem:[#allocation24_spill]] %s2502_s3 }
   0x2   :  { %2525 = sst [smem:[#allocation25_spill]] %s2503_s4 }
   0x3   :  { %12 = vsyncpa [#allocation4], 0 }
   0x4   :  { %14 = vsyncpa [#allocation4 + $0x1], 0 }
   0x5   :  { %15 = vsyncpa [#allocation7], 0 }
   0x6   :  { %17 = vsyncpa [#allocation7 + $0x1], 0 }
   0x7   :  { %18 = vsyncpa [#allocation5], 0 }
   0x8   :  { %20 = vsyncpa [#allocation5 + $0x1], 0  ;;  %s1982_s24 = smov 0   ;;  %s1984_s25 = smov 0  }
   0x9   :  { %s1986_s26 = smov 0   ;;  %s1988_s27 = smov 0  }
   0xa   :  { %s1990_s28 = smov 0   ;;  %s1992_s29 = smov 0  }
   0xb   :  { %s1994_s30 = smov 0   ;;  %s1996_s8 = smov 0  }
   0xc   :  { %s1998_s9 = smov 0   ;;  %s2000_s10 = smov 0  }
   0xd   :  { %s2002_s11 = smov 0  }
   0xe LB: > { %2526 = sst [smem:[#allocation12_spill]] %s1888_s24  ;;  %s1434_s12 = sadd.s32 4294967295, %s1928_s11   ;;  %s1928_s11 = sphi %s2002_s11, %s26_s11   ;;  %s1924_s10 = sphi %s2000_s10, %s2571_s10   ;;  %s1920_s9 = sphi %s1998_s9, %s2570_s9   ;;  %s1916_s8 = sphi %s1996_s8, %s2569_s8   ;;  %s1912_s30 = sphi %s1994_s30, %s2574_s30   ;;  %s1908_s29 = sphi %s1992_s29, %s2567_s29   ;;  %s1904_s28 = sphi %s1990_s28, %s2566_s28   ;;  %s1900_s27 = sphi %s1988_s27, %s2565_s27   ;;  %s1896_s26 = sphi %s1986_s26, %s2564_s26   ;;  %s1892_s25 = sphi %s1984_s25, %s2573_s25   ;;  %s1888_s24 = sphi %s1982_s24, %s2572_s24  }
   0xf   : > { %2527 = sst [smem:[#allocation13_spill]] %s1896_s26  ;;  %s1435_s13 = sadd.s32 4294967294, %s1928_s11  }
  0x10   : > { %2528 = sst [smem:[#allocation14_spill]] %s1904_s28  ;;  %s35_s14 = sadd.s32 1, %s1920_s9 }
  0x11   : > { %2529 = sst [smem:[#allocation15_spill]] %s1908_s29  ;;  %s38_s15 = sadd.s32 1, %s1924_s10 }
  0x12   : > { %2530 = sst [smem:[#allocation16_spill]] %s1920_s9  ;;  %p36_p0 = scmp.ge.s32.totalorder %s35_s14, 2 }
  0x13   : > { %2531 = sst [smem:[#allocation17_spill]] %s1924_s10  ;;  %s123_s16 = sadd.s32 1, %s1908_s29 }
  0x14   : > { %2532 = sst [smem:[#allocation18_spill]] %s1928_s11  ;;  %p130_p1 = scmp.ne.s32.totalorder %s1908_s29, %s1904_s28 }
  0x15   : > { %p131_p2 = scmp.eq.s32.totalorder %s1928_s11, 0  ;;  %s2576_s14 = smov (%p36_p0, %s35_s14), 0 }
  0x16   : > { %2533 = sst [smem:[#allocation19_spill]] %s2576_s14  ;;  %s2578_s15 = smov (!%p36_p0, %s38_s15), %s1924_s10 }
  0x17   : > { %s120_s17 = ssub.s32 %s1920_s9, %s2576_s14  ;;  %p2048_p3 = por %p131_p2, %p130_p1 }
  0x18   : > { %p40_p4 = scmp.ge.s32.totalorder %s2578_s15, 2  ;;  %p121_p5 = scmp.eq.s32.totalorder %s120_s17, 0 }
  0x19   : > { %p136_p6 = scmp.ne.s32.totalorder %s1904_s28, %s1900_s27  ;;  %p137_p7 = scmp.eq.s32.totalorder %s1434_s12, 0 }
  0x1a   : > { %s2580_s15 = smov (%p40_p4, %s2578_s15), 0  ;;  %s227_s22 = sadd.s32 1, %s1896_s26 }
  0x1b   : > { %2535 = sst [smem:[#allocation20_spill]] %s2580_s15  ;;  %p2058_p8 = por %p137_p7, %p136_p6 }
  0x1c   : > { %s2056_s19 = scalar_select %p121_p5, %s1908_s29, %s123_s16  }
  0x1d   : > { %s2537_s20 = scalar_select %p2058_p8, 1, 0 }
  0x1e   : > { %2536 = sst [smem:[#allocation21_spill]] %s2056_s19  ;;  %s224_s21 = ssub.s32 %s1924_s10, %s2580_s15 }
  0x1f   : > { %p225_p9 = scmp.eq.s32.totalorder %s224_s21, 0  ;;  %p237_p10 = scmp.ne.s32.totalorder %s1896_s26, %s1892_s25 }
  0x20   : > { %p238_p11 = scmp.eq.s32.totalorder %s1434_s12, 3  ;;  %p243_p13 = scmp.ne.s32.totalorder %s1892_s25, %s1888_s24 }
  0x21   : > { %s2068_s23 = scalar_select %p225_p9, %s1896_s26, %s227_s22  }
  0x22   : > { %p2070_p12 = por %p238_p11, %p237_p10  ;;  %p244_p0 = scmp.eq.s32.totalorder %s1435_s13, 3 }
  0x23   : > { %2538 = sst [smem:[#allocation22_spill]] %s2068_s23  ;;  %p1591_p1 = scmp.lt.s32.totalorder %s1928_s11, 4 }
  0x24   : > { %s2539_s27 = scalar_select %p2070_p12, 1, 0 }
  0x25   : > { %s2078_s16 = sand.u32 1, %s1908_s29   ;;  %p2080_p2 = por %p244_p0, %p243_p13 }
  0x26   : > { %s2511_s21 = sshll.u32 %s2078_s16, 4  ;;  %s2512_s12 = sshll.u32 %s1920_s9, 8 }
  0x27   : > { %s2540_s17 = scalar_select %p2080_p2, 1, 0 }
  0x28   : > { %s2542_s3 = sld [smem:[#allocation24_spill]]  ;;  %s294_s13 = scalar_lea.vmem [#allocation3], %s2511_s21 }
  0x29   : > { %2541 = sst [smem:[#allocation23_spill]] %s2540_s17  ;;  %s301_s10 = sshll.u32 %s294_s13, 4  ;;  %s2101_s10 = int_to_ptr.vmem [resolvable:$true] %s301_s10 }
  0x2a   : > { %p2097_p4 = pnand %p1591_p1, %p2048_p3 }
  0x2c   : > { %p1744_p6 = pneg %p2097_p4 }
  0x2e   : > { %s2091_s14 = scalar_lea.hbm %s2542_s3, %s2512_s12  ;;  %s1747_s18 = scalar_lea.hbm %s2542_s3, 512 }
  0x2f   : > { %s1742_s15 = scalar_lea.hbm %s2091_s14, 256  ;;  %p1748_p3 = scmp.lt.u32.totalorder %s2091_s14, %s2542_s3 }
  0x30   : > { %p1743_p5 = scmp.ne.s32.totalorder %s2091_s14, %s1742_s15  ;;  %p1749_p10 = scmp.lt.u32.totalorder %s1747_s18, %s1742_s15 }
  0x31   : > { %p1751_p13 = scmp.lt.u32.totalorder %s1742_s15, %s2091_s14 }
  0x32   : > { %p1745_p7 = pnand %p1744_p6, %p1743_p5  ;;  %p1750_p11 = por %p1749_p10, %p1748_p3 }
  0x34   : > { %p1746_p9 = pneg %p1745_p7  ;;  %p1752_p0 = por %p1751_p13, %p1750_p11 }
  0x36   : > { %p1753_p1 = pnand %p1752_p0, %p1746_p9 }
  0x38   : > { %1756 = shalt.err (!%p1753_p1)
}
  0x39   : > { %s1757_s29 = scalar_lea.vmem %s2101_s10, 256  ;;  %s1930_s22 = smov [#allocation3]  }
  0x3a   : > { %p1758_p5 = scmp.ne.s32.totalorder %s2101_s10, %s1757_s29  ;;  %s1762_s13 = sshll.u32 %s1930_s22, 4  ;;  %s1763_s13 = int_to_ptr.vmem [resolvable:$false] %s1762_s13 }
  0x3b   : > { %s1764_s21 = scalar_lea.vmem %s1763_s13, 512  ;;  %p1765_p12 = scmp.lt.s32.totalorder %s2101_s10, %s1763_s13 }
  0x3c   : > { %p1760_p7 = pnand %p1758_p5, %p1744_p6  ;;  %p1766_p3 = scmp.lt.s32.totalorder %s1764_s21, %s1757_s29 }
  0x3e   : > { %p1761_p2 = pneg %p1760_p7  ;;  %p1767_p10 = por %p1766_p3, %p1765_p12 }
  0x40   : > { %p1768_p11 = pnand %p1767_p10, %p1761_p2 }
  0x42   : > { %1771 = shalt.err (!%p1768_p11)
}
  0x43   : > { %s2516_s12 = smov 64   ;;  %s1932_s15 = smov 4  }
  0x44   : > { %s2544_s29 = scalar_lea.sflag [#allocation4], %s2078_s16  ;;  %p1444_p12 = scmp.ge.s32.totalorder %s1928_s11, 1 }
  0x45   : > { %1583 = dma.hbm_to_vmem [thread:$0]  (!%p2097_p4), %s2091_s14, 256, %s2101_s10, %s2544_s29, %s2516_s12, %s2516_s12, %s1932_s15  }
  0x46   : > { %p346_p2 = scmp.lt.s32.totalorder %s1928_s11, 5  ;;  %s2546_s22 = sshll.u32 %s1920_s9, 8 }
  0x47   : > { %s2547_s4 = sld [smem:[#allocation25_spill]]  ;;  %s2548_s23 = sshll.u32 %s2078_s16, 4 }
  0x48   : > { %p2136_p9 = pnand %p1444_p12, %p346_p2  ;;  %s315_s26 = scalar_lea.vmem [#allocation6], %s2548_s23 }
  0x49   : > { %s322_s17 = sshll.u32 %s315_s26, 4  ;;  %s312_s10 = scalar_lea.sflag [#allocation7], %s2078_s16  ;;  %s2149_s17 = int_to_ptr.vmem [resolvable:$true] %s322_s17 }
  0x4d   : > { %s2145_s3 = scalar_lea.hbm %s2547_s4, %s2546_s22  ;;  %s1777_s22 = scalar_lea.hbm %s2547_s4, 512 }
  0x4e   : > { %s1772_s14 = scalar_lea.hbm %s2145_s3, 256  ;;  %p1778_p5 = scmp.lt.u32.totalorder %s2145_s3, %s2547_s4 }
  0x4f   : > { %p1773_p13 = scmp.ne.s32.totalorder %s2145_s3, %s1772_s14  ;;  %p1779_p7 = scmp.lt.u32.totalorder %s1777_s22, %s1772_s14 }
  0x50   : > { %p1781_p10 = scmp.lt.u32.totalorder %s1772_s14, %s2145_s3 }
  0x51   : > { %p1775_p0 = pnand %p1773_p13, %p1744_p6  ;;  %p1780_p3 = por %p1779_p7, %p1778_p5 }
  0x53   : > { %p1776_p1 = pneg %p1775_p0  ;;  %p1782_p11 = por %p1781_p10, %p1780_p3 }
  0x55   : > { %p1783_p12 = pnand %p1782_p11, %p1776_p1 }
  0x57   : > { %1786 = shalt.err (!%p1783_p12)
}
  0x58   : > { %s1787_s26 = scalar_lea.vmem %s2149_s17, 256  ;;  %s1933_s23 = smov [#allocation6]  }
  0x59   : > { %p1788_p2 = scmp.ne.s32.totalorder %s2149_s17, %s1787_s26  ;;  %s1792_s29 = sshll.u32 %s1933_s23, 4  ;;  %s1793_s29 = int_to_ptr.vmem [resolvable:$false] %s1792_s29 }
  0x5a   : > { %s1794_s12 = scalar_lea.vmem %s1793_s29, 512  ;;  %p1795_p8 = scmp.lt.s32.totalorder %s2149_s17, %s1793_s29 }
  0x5b   : > { %p1790_p13 = pnand %p1788_p2, %p1744_p6  ;;  %p1796_p5 = scmp.lt.s32.totalorder %s1794_s12, %s1787_s26 }
  0x5d   : > { %p1791_p0 = pneg %p1790_p13  ;;  %p1797_p7 = por %p1796_p5, %p1795_p8 }
  0x5f   : > { %p1798_p3 = pnand %p1797_p7, %p1791_p0 }
  0x61   : > { %1801 = shalt.err (!%p1798_p3)
}
  0x62   : > { %s2549_s14 = smov 64   ;;  %350 = sbr.rel (%p2136_p9) target bundleno = 2473 (0x9a9), region = 48 }
  0x63   : > { %1586 = dma.hbm_to_vmem [thread:$0]  (!%p2097_p4), %s2145_s3, 256, %s2149_s17, %s312_s10, %s2549_s14, %s2549_s14, %s1932_s15  }
  0x64   : > { %s352_s13 = sand.u32 (!%p2136_p9), 1, %s1904_s28   ;;  %p2550_p8 = scmp.ne.s32.totalorder (!%p2136_p9), %s2537_s20, 0 }
  0x65   : > { %s1445_s22 = sshll.u32 (!%p2136_p9), %s352_s13, 4  ;;  %s353_s21 = scalar_lea.sflag (!%p2136_p9), [#allocation4], %s352_s13 }
  0x66   : > { %s2183_s26 = scalar_lea.vmem (!%p2136_p9), [#allocation3], %s1445_s22 }
  0x69   : > { %1875 = dma.done.wait (%p2550_p8), %s353_s21, 256  }
  0x6a   : > { %1877 = vsyncadd (%p2550_p8), %s353_s21, 4294967040  ;;  %s362_s19 = scalar_lea.sflag [#allocation7], %s352_s13  ;;  %s2189_s16 = scalar_lea.vmem [#allocation6], %s1445_s22 }
  0x6b   : > { %1879 = dma.done.wait (%p2550_p8), %s362_s19, 256  }
  0x6c   : > { %1881 = vsyncadd (%p2550_p8), %s362_s19, 4294967040  ;;  %s2518_s3 = sand.u32 1, %s1892_s25   ;;  %s1448_s17 = sshll.u32 %s1916_s8, 1 }
  0x6d   : > { %s1447_s15 = sshll.u32 %s2518_s3, 4  ;;  %p427_p4 = scmp.lt.s32.totalorder %s1448_s17, 3 }
  0x6e   : > { %p438_p6 = scmp.lt.s32.totalorder %s1912_s30, 1  ;;  %p1458_p9 = scmp.ne.s32.totalorder %s1912_s30, 0 }
  0x6f   : > { %s2582_s17 = smov (!%p427_p4, %s1448_s17), 3  ;;  %vm473_vm0 = vcmask (!%p1458_p9), 261120  }
  0x70   : > { %s439_s18 = scalar_select %p438_p6, %s1912_s30, 1 }
  0x71   : > { %s1449_s10 = sshll.u32 %s2582_s17, 3  ;;  %s1451_s23 = sshll.u32 %s2582_s17, 2 }
  0x72   : > { %s430_s20 = scalar_lea.vmem %s2499_s0, %s1449_s10  ;;  %s2207_s22 = scalar_lea.vmem %s2500_s1, %s1451_s23 }
  0x73   : > { %s1495_s21 = sshll.u32 %s439_s18, 4  ;;  %s2222_s10 = scalar_lea.vmem [#allocation8], %s1447_s15  ;;  %v459_v0 = vld [vmem:[%s430_s20] sm:$0xff] (!%p1458_p9)  ;;  %v460_v2 = vld [vmem:[%s430_s20 + $0x8] sm:$0xff] (!%p1458_p9) }
  0x74   : > { %s442_s3 = scalar_lea.vmem %s2501_s2, %s1495_s21  ;;  %s2215_s24 = scalar_lea.vmem %s2504_s5, %s1495_s21  ;;  %v1459_v1 = vld [vmem:[%s2207_s22] ss:$0 sm:$0xff] (!%p1458_p9)  ;;  %v1460_v4 = vld [vmem:[%s2207_s22 + $0x4] ss:$0 sm:$0xff] (!%p1458_p9) }
  0x75   : > { %s2220_s29 = scalar_lea.vmem %s2505_s6, %s1495_s21  ;;  %458 = sbr.rel (%p1458_p9) target bundleno = 124 (0x7c), region = 60  ;;  %v471_v3 = vadd.f32 (!%p1458_p9), %v1459_v1, %v459_v0  ;;  %v472_v5 = vadd.f32 (!%p1458_p9), %v1460_v4, %v460_v2 }
  0x77   : > { %474 = vst.msk [vmem:[#allocation2] sm:$0xff] (!%p1458_p9), %vm473_vm0, %v471_v3  ;;  %475 = vst.msk [vmem:[#allocation2 + $0x8] sm:$0xff] (!%p1458_p9), %vm473_vm0, %v472_v5 }
  0x7c PF: > { %v1690_v6 = vld [vmem:[%s442_s3] sm:$0xff]   ;;  %v480_v7 = vlaneseq  ;;  %v1934_v8 = vmov 0.0   ;;  %v1691_v9 = vld [vmem:[%s442_s3 + $0x8] sm:$0xff]   ;;  %vm1935_vm1 = vmmov 0   ;;  %vm523_vm2 = vcmask 261120   ;;  %s1936_s4 = smov 32  }
  0x7d   : > { %1521 = vmatprep.subr.bf16.mxu0 %v1934_v8  ;;  %1525 = vmatprep.mubr.msk.bf16.mxu0 %vm1935_vm1, %v1934_v8  ;;  %v2238_v13 = vld [vmem:[%s2220_s29] sm:$0xff]  ;;  %s1937_s28 = smov 96   ;;  %vm698_vm13 = vcmask 130048   ;;  %s1938_s9 = smov 64  }
  0x7e   : > { %1522 = vmatpush3.bf16.msra.mxu0 %v1690_v6  ;;  %v2230_v10 = vld [vmem:[#allocation2] sm:$0xff]  ;;  %v2232_v11 = vld [vmem:[#allocation2 + $0x8] sm:$0xff]  ;;  %v2234_v12 = vshrl.u32 %v480_v7, 7  ;;  %v2247_v17 = vand.u32 127, %v480_v7  ;;  %p1485_p1 = scmp.ne.s32.totalorder %s1912_s30, 1 }
  0x7f   : > { %1523 = vmatprep.subr.bf16.mxu0 %v1934_v8  ;;  %v506_v15 = vpack.c.bf16 %v2232_v11, %v2230_v10 }
  0x80   : > { %v576_v14 = vsub.s32 1, %v2234_v12  ;;  %v2250_v18 = vsub.s32 0, %v2234_v12  ;;  %vm483_vm3 = vcmp.ge.s32.totalorder %v2247_v17, 8  ;;  %vm487_vm4 = vcmp.lt.s32.totalorder %v2247_v17, 16 }
  0x81   : > { %vm484_vm5 = vcmp.ge.s32.totalorder %v2247_v17, 16  ;;  %vm488_vm6 = vcmp.lt.s32.totalorder %v2247_v17, 24  ;;  %vm486_vm7 = vcmp.lt.s32.totalorder %v2247_v17, 8  ;;  %vm2259_vm8 = vmand %vm483_vm3, %vm487_vm4  ;;  %vm485_vm9 = vcmp.ge.s32.totalorder %v2247_v17, 24 }
  0x82   : > { %1524 = vmatpush3.bf16.msra.mxu0 %v1691_v9  ;;  %v577_v16 = vrot.slane %v2238_v13, %v576_v14  ;;  %v571_v19 = vrot.slane %v2238_v13, %v2250_v18  ;;  %vm489_vm10 = vcmp.lt.s32.totalorder %v2247_v17, 32  ;;  %vm2265_vm11 = vmand %vm484_vm5, %vm488_vm6  ;;  %v502_v24 = vsel %vm486_vm7, 0.35355338, %v1934_v8 }
  0x83   : > { %vm2274_vm12 = vmand %vm485_vm9, %vm489_vm10  ;;  %v503_v28 = vsel %vm2259_vm8, 0.35355338, %v1934_v8  ;;  %v504_v29 = vsel %vm2265_vm11, 0.35355338, %v1934_v8 }
  0x84   : > { %579 = vrot.lane.b32.xlu0 %v577_v16, %s1936_s4  ;;  %v505_v35 = vsel %vm2274_vm12, 0.35355338, %v1934_v8  ;;  %v1464_v17 = vsel %vm2274_vm12, 1.0, %v1934_v8 }
  0x85   : > { %1526 = vmatmul.mubr.msk.bf16.vlgmr.msra.gmra.mrb[0].mxu0 %vm523_vm2, %v506_v15 }
  0xf6   : > { %v580_v22 = vpop.permute.xlu0 %579 }
 0x158   : > { %v2269_v23 = vpop.f32.mrb[0].mxu0 }
 0x159   : > { %v572_v26 = vadd.f32 %v571_v19, %v2269_v23  ;;  %v1527_v27 = vpop.f32.mrb[1].mxu0  ;;  %v582_v31 = vadd.f32 %v580_v22, %v2269_v23 }
 0x15a   : > { %v2285_v30 = vpop.f32.mrb[2].mxu0 }
 0x15b   : > { %v573_v32 = vadd.f32 %v571_v19, %v2285_v30  ;;  %v583_v33 = vadd.f32 %v580_v22, %v2285_v30  ;;  %v1528_v34 = vpop.f32.mrb[3].mxu0  ;;  %v594_v36 = vmul.f32 %v572_v26, %v502_v24  ;;  %v596_v37 = vmul.f32 %v572_v26, %v503_v28 }
 0x15c   : > { %v598_v38 = vmul.f32 %v572_v26, %v504_v29  ;;  %v600_v43 = vmul.f32 %v572_v26, %v505_v35  ;;  %v586_v19 = vsub.s32 2, %v2234_v12 }
 0x15d   : > { %v606_v39 = vpack.c.bf16 %v583_v33, %v582_v31  ;;  %v595_v40 = vmul.f32 %v573_v32, %v502_v24  ;;  %v597_v41 = vmul.f32 %v573_v32, %v503_v28  ;;  %v599_v42 = vmul.f32 %v573_v32, %v504_v29 }
 0x15e   : > { %v601_v44 = vmul.f32 %v573_v32, %v505_v35  ;;  %v587_v22 = vrot.slane %v2238_v13, %v586_v19 }
 0x15f   : > { %608 = vrot.lane.b32.xlu0 %v606_v39, %s1937_s28  ;;  %v602_v45 = vpack.c.bf16 %v595_v40, %v594_v36  ;;  %v603_v46 = vpack.c.bf16 %v597_v41, %v596_v37  ;;  %v604_v47 = vpack.c.bf16 %v599_v42, %v598_v38 }
 0x160   : > { %v605_v48 = vpack.c.bf16 %v601_v44, %v600_v43 }
 0x161   : > { %1531 = vmatprep.mubr.msk.bf16.mxu1 %vm523_vm2, %v602_v45 }
 0x1d1   : > { %v609_v49 = vpop.permute.xlu0 %608 }
 0x1d2   : > { %1573 = vmatprep.subr.msk.bf16.mxu1 %vm523_vm2, %v609_v49  ;;  %v623_v50 = vsel %vm523_vm2, %v609_v49, 0 }
 0x1d3   : > { %1530 = vmatpush3.bf16.xpose.msra.mxu1 %v623_v50 }
 0x1d4   : > { %1549 = vmatprep.subr.bf16.mxu1 %v1934_v8 }
 0x1da   : > { %1532 = vmatmul.mubr.msk.bf16.vlgmr.msra.gmra.mrb[0].mxu1 %vm523_vm2, %v603_v46 }
 0x1db   : > { %1535 = vmatprep.mubr.msk.bf16.mxu1 %vm523_vm2, %v604_v47 }
 0x1e2   : > { %1536 = vmatmul.mubr.msk.bf16.gmra.mrb[4].mxu1 %vm523_vm2, %v605_v48 }
 0x1e3   : > { %1553 = vmatprep.mubr.msk.bf16.mxu1 %vm1935_vm1, %v1934_v8 }
 0x2ad   : > { %v1533_v51 = vpop.f32.mrb[0].mxu1 }
 0x2ae   : > { %v692_v52 = vsel %vm486_vm7, %v1533_v51, -1e+30  ;;  %v659_v53 = vpop.f32.mrb[1].mxu1 }
 0x2af   : > { %v690_v54 = vsel %vm486_vm7, %v659_v53, -1e+30  ;;  %v1534_v55 = vpop.f32.mrb[2].mxu1  ;;  %v705_v56 = vsel %vm698_vm13, %v692_v52, -inf }
 0x2b0   : > { %706 = vmax.xlane.f32.xlu0 %v705_v56  ;;  %v662_v57 = vpop.f32.mrb[3].mxu1  ;;  %v699_v58 = vsel %vm698_vm13, %v690_v54, -inf  ;;  %v693_v59 = vsel %vm2259_vm8, %v1534_v55, -1e+30 }
 0x2b1   : > { %700 = vmax.xlane.f32.xlu1 %v699_v58  ;;  %v708_v60 = vsel %vm698_vm13, %v693_v59, -inf  ;;  %v691_v61 = vsel %vm2259_vm8, %v662_v57, -1e+30 }
 0x2b2   : > { %v702_v2 = vsel %vm698_vm13, %v691_v61, -inf }
 0x2b5   : > { %709 = vmax.xlane.f32.xlu1 %v708_v60  ;;  %v1537_v62 = vpop.f32.mrb[4].mxu1 }
 0x2b6   : > { %v675_v63 = vpop.f32.mrb[5].mxu1  ;;  %v696_v3 = vsel %vm486_vm7, %v1537_v62, -1e+30 }
 0x2b7   : > { %v1538_v0 = vpop.f32.mrb[6].mxu1  ;;  %v717_v4 = vsel %vm698_vm13, %v696_v3, -inf  ;;  %v694_v5 = vsel %vm486_vm7, %v675_v63, -1e+30 }
 0x2b8   : > { %v678_v1 = vpop.f32.mrb[7].mxu1  ;;  %v711_v6 = vsel %vm698_vm13, %v694_v5, -inf  ;;  %v697_v15 = vsel %vm2259_vm8, %v1538_v0, -1e+30 }
 0x2b9   : > { %703 = vmax.xlane.f32.xlu1 %v702_v2  ;;  %v695_v7 = vsel %vm2259_vm8, %v678_v1, -1e+30  ;;  %v720_v16 = vsel %vm698_vm13, %v697_v15, -inf }
 0x2ba   : > { %v714_v9 = vsel %vm698_vm13, %v695_v7, -inf }
 0x2bd   : > { %718 = vmax.xlane.f32.xlu1 %v717_v4 }
 0x2c1   : > { %712 = vmax.xlane.f32.xlu1 %v711_v6 }
 0x2c5   : > { %715 = vmax.xlane.f32.xlu1 %v714_v9 }
 0x2c9   : > { %721 = vmax.xlane.f32.xlu1 %v720_v16 }
 0x2da   : > { %589 = vrot.lane.b32.xlu1 %v587_v22, %s1938_s9 }
 0x33d   : > { %v707_v24 = vpop.xlane.xlu0 %706 }
 0x33e   : > { %v725_v26 = vsub.f32 %v692_v52, %v707_v24  ;;  %v701_v27 = vpop.xlane.xlu1 %700 }
 0x33f   : > { %v723_v28 = vsub.f32 %v690_v54, %v701_v27 }
 0x340   : > { %v735_v29 = vmul.f32 1.442695, %v725_v26 }
 0x341   : > { %v731_v31 = vmul.f32 1.442695, %v723_v28 }
 0x342   : > { %1698 = vpow2.f32 %v735_v29  ;;  %v710_v32 = vpop.xlane.xlu1 %709 }
 0x343   : > { %1700 = vpow2.f32 %v731_v31  ;;  %v726_v33 = vsub.f32 %v693_v59, %v710_v32 }
 0x345   : > { %v737_v34 = vmul.f32 1.442695, %v726_v33 }
 0x346   : > { %v704_v35 = vpop.xlane.xlu1 %703 }
 0x347   : > { %1702 = vpow2.f32 %v737_v34  ;;  %v724_v36 = vsub.f32 %v691_v61, %v704_v35 }
 0x349   : > { %v733_v37 = vmul.f32 1.442695, %v724_v36 }
 0x34a   : > { %v719_v38 = vpop.xlane.xlu1 %718 }
 0x34b   : > { %1704 = vpow2.f32 %v733_v37  ;;  %v729_v39 = vsub.f32 %v696_v3, %v719_v38 }
 0x34c   : > { %v2329_v40 = vpop.eup %1698 }
 0x34d   : > { %v1701_v41 = vpop.eup %1700  ;;  %v743_v42 = vmul.f32 1.442695, %v729_v39  ;;  %v753_v43 = vsel %vm698_vm13, %v2329_v40, 0.0 }
 0x34e   : > { %v713_v44 = vpop.xlane.xlu1 %712  ;;  %754 = vadd.xlane.f32.xlu1 %v753_v43  ;;  %v747_v45 = vsel %vm698_vm13, %v1701_v41, 0.0 }
 0x34f   : > { %1706 = vpow2.f32 %v743_v42  ;;  %v727_v46 = vsub.f32 %v694_v5, %v713_v44  ;;  %748 = vadd.xlane.f32.xlu0 %v747_v45 }
 0x351   : > { %v1703_v47 = vpop.eup %1702  ;;  %v739_v48 = vmul.f32 1.442695, %v727_v46 }
 0x352   : > { %v716_v49 = vpop.xlane.xlu1 %715  ;;  %v756_v50 = vsel %vm698_vm13, %v1703_v47, 0.0 }
 0x353   : > { %1708 = vpow2.f32 %v739_v48  ;;  %757 = vadd.xlane.f32.xlu0 %v756_v50  ;;  %v728_v52 = vsub.f32 %v695_v7, %v716_v49  ;;  %v1462_v48 = vsel %vm2259_vm8, 1.0, %v1934_v8  ;;  %v1461_v49 = vsel %vm486_vm7, 1.0, %v1934_v8 }
 0x355   : > { %v1705_v51 = vpop.eup %1704  ;;  %v741_v57 = vmul.f32 1.442695, %v728_v52 }
 0x356   : > { %v722_v53 = vpop.xlane.xlu1 %721  ;;  %v750_v54 = vsel %vm698_vm13, %v1705_v51, 0.0 }
 0x357   : > { %v730_v55 = vsub.f32 %v697_v15, %v722_v53  ;;  %751 = vadd.xlane.f32.xlu0 %v750_v54 }
 0x359   : > { %v1707_v56 = vpop.eup %1706  ;;  %v745_v58 = vmul.f32 1.442695, %v730_v55 }
 0x35a   : > { %v590_v59 = vpop.permute.xlu1 %589  ;;  %v765_v60 = vsel %vm698_vm13, %v1707_v56, 0.0 }
 0x35b   : > { %1710 = vpow2.f32 %v745_v58  ;;  %v592_v61 = vadd.f32 %v590_v59, %v2269_v23  ;;  %v593_v62 = vadd.f32 %v590_v59, %v2285_v30  ;;  %766 = vadd.xlane.f32.xlu0 %v765_v60 }
 0x35c   : > { %1712 = vpow2.f32 %v741_v57 }
 0x35d   : > { %v1709_v63 = vpop.eup %1708  ;;  %v791_v0 = vpack.c.bf16 %v593_v62, %v592_v61 }
 0x35e   : > { %v759_v1 = vsel %vm698_vm13, %v1709_v63, 0.0 }
 0x35f   : > { %760 = vadd.xlane.f32.xlu0 %v759_v1 }
 0x365   : > { %v1711_v2 = vpop.eup %1710 }
 0x366   : > { %v768_v3 = vsel %vm698_vm13, %v1711_v2, 0.0  ;;  %v1713_v4 = vpop.eup %1712 }
 0x367   : > { %769 = vadd.xlane.f32.xlu0 %v768_v3  ;;  %v762_v5 = vsel %vm698_vm13, %v1713_v4, 0.0 }
 0x36b   : > { %763 = vadd.xlane.f32.xlu0 %v762_v5 }
 0x381   : > { %793 = vrot.lane.b32.xlu0 %v791_v0, %s1938_s9 }
 0x3db   : > { %v755_v15 = vpop.xlane.xlu1 %754 }
 0x3dc   : > { %v749_v23 = vpop.xlane.xlu0 %748 }
 0x3dd   : > { %1714 = vrcp.f32 %v749_v23 }
 0x3e0   : > { %v758_v6 = vpop.xlane.xlu0 %757 }
 0x3e4   : > { %v752_v30 = vpop.xlane.xlu0 %751 }
 0x3e5   : > { %1716 = vrcp.f32 %v752_v30 }
 0x3e6   : > { %1718 = vrcp.f32 %v758_v6 }
 0x3e7   : > { %v1715_v9 = vpop.eup %1714  ;;  %1720 = vrcp.f32 %v755_v15 }
 0x3e8   : > { %v767_v7 = vpop.xlane.xlu0 %766  ;;  %v779_v22 = vmul.f32 %v1715_v9, %v1701_v41 }
 0x3ec   : > { %v761_v19 = vpop.xlane.xlu0 %760 }
 0x3ef   : > { %v1717_v16 = vpop.eup %1716 }
 0x3f0   : > { %v780_v24 = vmul.f32 %v1717_v16, %v1705_v51  ;;  %v1719_v28 = vpop.eup %1718 }
 0x3f1   : > { %v1721_v31 = vpop.eup %1720  ;;  %v782_v32 = vmul.f32 %v1719_v28, %v1703_v47  ;;  %v1693_v47 = vld [vmem:[%s2183_s26 + $0x8] sm:$0xff]  }
 0x3f2   : > { %v787_v26 = vpack.c.bf16 %v780_v24, %v779_v22  ;;  %v781_v34 = vmul.f32 %v1721_v31, %v2329_v40  ;;  %v1692_v40 = vld [vmem:[%s2183_s26] sm:$0xff]   ;;  %v902_v24 = vsub.s32 3, %v2234_v12 }
 0x3f3   : > { %1550 = vmatpush3.bf16.msra.mxu1 %v1692_v40 }
 0x3f4   : > { %1541 = vmatprep.mubr.msk.bf16.mxu0 %vm698_vm13, %v787_v26  ;;  %v770_v27 = vpop.xlane.xlu0 %769  ;;  %v788_v35 = vpack.c.bf16 %v782_v32, %v781_v34  ;;  %1551 = vmatprep.subr.bf16.mxu1 %v1934_v8  ;;  %v903_v26 = vrot.slane %v2238_v13, %v902_v24 }
 0x3f5   : > { %1722 = vrcp.f32 %v770_v27 }
 0x3f6   : > { %1724 = vrcp.f32 %v761_v19 }
 0x3f7   : > { %1726 = vrcp.f32 %v767_v7  ;;  %1552 = vmatpush3.bf16.msra.mxu1 %v1693_v47 }
 0x3f8   : > { %v764_v29 = vpop.xlane.xlu0 %763  ;;  %1565 = vmatprep.subr.bf16.mxu1 %v1934_v8 }
 0x3f9   : > { %1728 = vrcp.f32 %v764_v29 }
 0x3fc   : > { %v794_v33 = vpop.permute.xlu0 %793 }
 0x3fd   : > { %1539 = vmatprep.subr.bf16.mxu0 %v794_v33 }
 0x3fe   : > { %1540 = vmatpush3.bf16.msra.mxu0 %v794_v33 }
 0x3ff   : > { %1557 = vmatprep.subr.bf16.mxu0 %v1934_v8  ;;  %v1723_v36 = vpop.eup %1722 }
 0x400   : > { %v1725_v37 = vpop.eup %1724  ;;  %v786_v41 = vmul.f32 %v1723_v36, %v1711_v2 }
 0x401   : > { %1542 = vmatmul.mubr.msk.bf16.vlgmr.msra.gmra.mrb[4].mxu0 %vm698_vm13, %v788_v35  ;;  %v1727_v38 = vpop.eup %1726  ;;  %v783_v42 = vmul.f32 %v1725_v37, %v1709_v63  ;;  %v1463_v63 = vsel %vm2265_vm11, 1.0, %v1934_v8 }
 0x402   : > { %v785_v44 = vmul.f32 %v1727_v38, %v1707_v56 }
 0x403   : > { %v1729_v39 = vpop.eup %1728 }
 0x404   : > { %v784_v43 = vmul.f32 %v1729_v39, %v1713_v4  ;;  %v790_v46 = vpack.c.bf16 %v786_v41, %v785_v44 }
 0x406   : > { %v789_v45 = vpack.c.bf16 %v784_v43, %v783_v42  ;;  %v1695_v43 = vld [vmem:[%s2189_s16 + $0x8] sm:$0xff]  }
 0x408   : > { %1545 = vmatprep.mubr.msk.bf16.mxu0 %vm698_vm13, %v789_v45 }
 0x409   : > { %1546 = vmatmul.mubr.msk.bf16.gmra.mrb[8].mxu0 %vm698_vm13, %v790_v46 }
 0x40a   : > { %1561 = vmatprep.mubr.msk.bf16.mxu0 %vm1935_vm1, %v1934_v8 }
 0x4d4   : > { %v1543_v50 = vpop.f32.mrb[4].mxu0 }
 0x4d5   : > { %v875_v51 = vmul.f32 %v1543_v50, %v1462_v48  ;;  %v842_v52 = vpop.f32.mrb[5].mxu0 }
 0x4d6   : > { %v873_v53 = vmul.f32 %v1461_v49, %v842_v52  ;;  %v1544_v54 = vpop.f32.mrb[6].mxu0 }
 0x4d7   : > { %v882_v55 = vsel %vm523_vm2, %v875_v51, 0.0  ;;  %v876_v56 = vmul.f32 %v1544_v54, %v1462_v48  ;;  %v845_v57 = vpop.f32.mrb[7].mxu0 }
 0x4d8   : > { %v881_v58 = vsel %vm523_vm2, %v873_v53, 0.0  ;;  %v874_v59 = vmul.f32 %v1461_v49, %v845_v57 }
 0x4d9   : > { %v883_v60 = vadd.f32 %v882_v55, %v881_v58  ;;  %v889_v20 = vsel %vm523_vm2, %v876_v56, 0.0  ;;  %v997_v58 = vsub.s32 6, %v2234_v12 }
 0x4da   : > { %v888_v61 = vsel %vm523_vm2, %v874_v59, 0.0 }
 0x4db   : > { %v890_v62 = vadd.f32 %v889_v20, %v888_v61  ;;  %v998_v20 = vrot.slane %v2238_v13, %v997_v58  ;;  %v1003_v61 = vsub.s32 7, %v2234_v12 }
 0x4dc   : > { %v1547_v0 = vpop.f32.mrb[8].mxu0 }
 0x4dd   : > { %v858_v1 = vpop.f32.mrb[9].mxu0  ;;  %v879_v2 = vmul.f32 %v1547_v0, %v1464_v17  ;;  %v1004_v0 = vrot.slane %v2238_v13, %v1003_v61 }
 0x4de   : > { %v877_v3 = vmul.f32 %v1463_v63, %v858_v1  ;;  %v1548_v4 = vpop.f32.mrb[10].mxu0 }
 0x4df   : > { %v861_v5 = vpop.f32.mrb[11].mxu0  ;;  %v880_v6 = vmul.f32 %v1548_v4, %v1464_v17  ;;  %v886_v9 = vsel %vm523_vm2, %v879_v2, 0.0 }
 0x4e0   : > { %v884_v23 = vsel %vm523_vm2, %v877_v3, 0.0  ;;  %v878_v30 = vmul.f32 %v1463_v63, %v861_v5 }
 0x4e1   : > { %v885_v7 = vadd.f32 %v884_v23, %v883_v60  ;;  %v893_v21 = vsel %vm523_vm2, %v880_v6, 0.0  ;;  %v1696_v6 = vld [vmem:[%s2215_s24] sm:$0xff]  }
 0x4e2   : > { %v891_v25 = vsel %vm523_vm2, %v878_v30, 0.0  ;;  %v1697_v30 = vld [vmem:[%s2215_s24 + $0x8] sm:$0xff]  }
 0x4e3   : > { %v887_v15 = vadd.f32 %v886_v9, %v885_v7  ;;  %v892_v16 = vadd.f32 %v891_v25, %v890_v62  ;;  %v1014_v7 = vsub.s32 4, %v2234_v12 }
 0x4e5   : > { %v894_v19 = vadd.f32 %v893_v21, %v892_v16  ;;  %v1015_v9 = vrot.slane %v2238_v13, %v1014_v7 }
 0x4e7   : > { %v895_v22 = vpack.c.bf16 %v894_v19, %v887_v15 }
 0x4e9   : > { %1554 = vmatmul.mubr.msk.bf16.vlgmr.msra.gmra.mrb[8].mxu1 %vm523_vm2, %v895_v22 }
 0x4ea   : > { %1569 = vmatprep.mubr.msk.bf16.mxu1 %vm1935_vm1, %v1934_v8  ;;  %1566 = vmatpush3.bf16.msra.mxu1 %v1696_v6 }
 0x4eb   : > { %1567 = vmatprep.subr.bf16.mxu1 %v1934_v8 }
 0x4ee   : > { %1568 = vmatpush3.bf16.msra.mxu1 %v1697_v30 }
 0x5bc   : > { %v953_v27 = vpop.f32.mrb[8].mxu1 }
 0x5bd   : > { %v954_v28 = vadd.f32 %v953_v27, %v903_v26  ;;  %v1555_v29 = vpop.f32.mrb[9].mxu1 }
 0x5be   : > { %v956_v31 = vpop.f32.mrb[10].mxu1 }
 0x5bf   : > { %v960_v32 = vadd.f32 %v954_v28, %v2230_v10  ;;  %v957_v33 = vadd.f32 %v956_v31, %v903_v26  ;;  %v1556_v34 = vpop.f32.mrb[11].mxu1  ;;  %v1694_v10 = vld [vmem:[%s2189_s16] sm:$0xff]   ;;  %v1081_v28 = vsub.s32 5, %v2234_v12 }
 0x5c0   : > { %1558 = vmatpush3.bf16.msra.mxu0 %v1694_v10 }
 0x5c1   : > { %v961_v35 = vadd.f32 %v957_v33, %v2232_v11  ;;  %v962_v36 = vsel %vm523_vm2, %v960_v32, 0.0  ;;  %v971_v37 = vmul.f32 %v960_v32, %v960_v32  ;;  %1559 = vmatprep.subr.bf16.mxu0 %v1934_v8  ;;  %v1082_v8 = vrot.slane %v2238_v13, %v1081_v28 }
 0x5c2   : > { %963 = vadd.xlane.f32.xlu1 %v962_v36 }
 0x5c3   : > { %v973_v38 = vsel %vm523_vm2, %v971_v37, 0.0  ;;  %v965_v39 = vsel %vm523_vm2, %v961_v35, 0.0  ;;  %v972_v41 = vmul.f32 %v961_v35, %v961_v35 }
 0x5c4   : > { %974 = vadd.xlane.f32.xlu0 %v973_v38  ;;  %1560 = vmatpush3.bf16.msra.mxu0 %v1695_v43 }
 0x5c5   : > { %v976_v42 = vsel %vm523_vm2, %v972_v41, 0.0 }
 0x5c6   : > { %966 = vadd.xlane.f32.xlu1 %v965_v39 }
 0x5ca   : > { %977 = vadd.xlane.f32.xlu1 %v976_v42 }
 0x64f   : > { %v964_v11 = vpop.xlane.xlu1 %963 }
 0x650   : > { %v969_v44 = vmul.f32 0.03125, %v964_v11 }
 0x651   : > { %v975_v45 = vpop.xlane.xlu0 %974 }
 0x652   : > { %v981_v46 = vmul.f32 %v969_v44, %v969_v44  ;;  %v979_v40 = vmul.f32 0.03125, %v975_v45  ;;  %v987_v60 = vsub.f32 %v960_v32, %v969_v44 }
 0x653   : > { %v967_v47 = vpop.xlane.xlu1 %966 }
 0x654   : > { %v983_v48 = vsub.f32 %v979_v40, %v981_v46  ;;  %v970_v49 = vmul.f32 0.03125, %v967_v47 }
 0x656   : > { %v985_v50 = vmax.f32 %v983_v48, 0.0  ;;  %v982_v53 = vmul.f32 %v970_v49, %v970_v49  ;;  %v988_v17 = vsub.f32 %v961_v35, %v970_v49 }
 0x657   : > { %v978_v51 = vpop.xlane.xlu1 %977 }
 0x658   : > { %v989_v52 = vadd.f32 1e-05, %v985_v50  ;;  %v980_v54 = vmul.f32 0.03125, %v978_v51 }
 0x65a   : > { %1730 = vrsqrt.f32 %v989_v52  ;;  %v984_v55 = vsub.f32 %v980_v54, %v982_v53 }
 0x65c   : > { %v986_v56 = vmax.f32 %v984_v55, 0.0 }
 0x65e   : > { %v990_v57 = vadd.f32 1e-05, %v986_v56 }
 0x660   : > { %1732 = vrsqrt.f32 %v990_v57  ;;  %v479_v57 = vld [vmem:[%s2220_s29 + $0x8] sm:$0x3] }
 0x661   : > { %v1176_v58 = vrot.slane %v479_v57, %v2250_v18 }
 0x664   : > { %v1731_v59 = vpop.eup %1730 }
 0x665   : > { %v993_v62 = vmul.f32 %v1731_v59, %v987_v60 }
 0x667   : > { %v999_v1 = vmul.f32 %v998_v20, %v993_v62 }
 0x669   : > { %v1005_v4 = vadd.f32 %v1004_v0, %v999_v1 }
 0x66a   : > { %v1733_v63 = vpop.eup %1732 }
 0x66b   : > { %v994_v2 = vmul.f32 %v1733_v63, %v988_v17 }
 0x66d   : > { %v1000_v3 = vmul.f32 %v998_v20, %v994_v2  ;;  %v1182_v20 = vrot.slane %v479_v57, %v576_v14 }
 0x66f   : > { %v1006_v5 = vadd.f32 %v1004_v0, %v1000_v3 }
 0x671   : > { %v1007_v23 = vpack.c.bf16 %v1006_v5, %v1005_v4 }
 0x673   : > { %1562 = vmatmul.mubr.msk.bf16.vlgmr.msra.gmra.mrb[12].mxu0 %vm523_vm2, %v1007_v23 }
 0x746   : > { %v1065_v25 = vpop.f32.mrb[12].mxu0 }
 0x747   : > { %v1066_v15 = vadd.f32 %v1065_v25, %v1015_v9  ;;  %v1563_v16 = vpop.f32.mrb[13].mxu0 }
 0x748   : > { %v1068_v21 = vpop.f32.mrb[14].mxu0 }
 0x749   : > { %v1069_v19 = vadd.f32 %v1068_v21, %v1015_v9  ;;  %v1564_v22 = vpop.f32.mrb[15].mxu0  ;;  %v1072_v24 = vmax.f32 %v1066_v15, 0.0 }
 0x74b   : > { %v1073_v26 = vmax.f32 %v1069_v19, 0.0 }
 0x74d   : > { %v1074_v27 = vpack.c.bf16 %v1073_v26, %v1072_v24 }
 0x74f   : > { %1570 = vmatmul.mubr.msk.bf16.vlgmr.msra.gmra.mrb[12].mxu1 %vm523_vm2, %v1074_v27 }
 0x822   : > { %v1132_v29 = vpop.f32.mrb[12].mxu1 }
 0x823   : > { %v1133_v31 = vadd.f32 %v1132_v29, %v1082_v8  ;;  %v1571_v32 = vpop.f32.mrb[13].mxu1 }
 0x824   : > { %v1135_v33 = vpop.f32.mrb[14].mxu1 }
 0x825   : > { %v1139_v34 = vadd.f32 %v1133_v31, %v1005_v4  ;;  %v1136_v35 = vadd.f32 %v1135_v33, %v1082_v8  ;;  %v1572_v36 = vpop.f32.mrb[15].mxu1  ;;  %v1225_v33 = vld [vmem:[%s2207_s22 + $0x1] sm:$0x1] (!%p1485_p1) }
 0x826   : > { %v1226_v36 = vld [vmem:[%s2207_s22 + $0x5] sm:$0x1] (!%p1485_p1) }
 0x827   : > { %v1140_v37 = vadd.f32 %v1136_v35, %v1006_v5  ;;  %v1141_v38 = vsel %vm523_vm2, %v1139_v34, 0.0  ;;  %v1149_v41 = vmul.f32 %v1139_v34, %v1139_v34  ;;  %v1227_v35 = vadd.f32 (!%p1485_p1), 1.0, %v1225_v33 }
 0x828   : > { %1142 = vadd.xlane.f32.xlu1 %v1141_v38 }
 0x829   : > { %v1144_v39 = vsel %vm523_vm2, %v1140_v37, 0.0  ;;  %v1151_v42 = vsel %vm523_vm2, %v1149_v41, 0.0  ;;  %v1150_v10 = vmul.f32 %v1140_v37, %v1140_v37  ;;  %v1232_v38 = vrot.slane (!%p1485_p1), %v1227_v35, %v2250_v18 }
 0x82b   : > { %v1154_v13 = vsel %vm523_vm2, %v1150_v10, 0.0  ;;  %v1486_v10 = vld [vmem:[%s2207_s22 + $0x2] ss:$0 sm:$0xff] (!%p1485_p1) }
 0x82c   : > { %1145 = vadd.xlane.f32.xlu1 %v1144_v39  ;;  %v1228_v39 = vadd.f32 (!%p1485_p1), 1.0, %v1226_v36 }
 0x830   : > { %1152 = vadd.xlane.f32.xlu1 %v1151_v42 }
 0x834   : > { %1155 = vadd.xlane.f32.xlu1 %v1154_v13 }
 0x8b5   : > { %v1143_v43 = vpop.xlane.xlu1 %1142 }
 0x8b6   : > { %v1147_v44 = vmul.f32 0.03125, %v1143_v43 }
 0x8b8   : > { %v1159_v46 = vmul.f32 %v1147_v44, %v1147_v44  ;;  %v1165_v59 = vsub.f32 %v1139_v34, %v1147_v44 }
 0x8b9   : > { %v1146_v11 = vpop.xlane.xlu1 %1145 }
 0x8ba   : > { %v1148_v40 = vmul.f32 0.03125, %v1146_v11  ;;  %v1236_v11 = vrot.slane (!%p1485_p1), %v1228_v39, %v2250_v18 }
 0x8bc   : > { %v1160_v50 = vmul.f32 %v1148_v40, %v1148_v40  ;;  %v1166_v62 = vsub.f32 %v1140_v37, %v1148_v40  ;;  %v1487_v40 = vld [vmem:[%s2207_s22 + $0x6] ss:$0 sm:$0xff] (!%p1485_p1) }
 0x8bd   : > { %v1153_v45 = vpop.xlane.xlu1 %1152 }
 0x8be   : > { %v1157_v47 = vmul.f32 0.03125, %v1153_v45 }
 0x8c0   : > { %v1161_v48 = vsub.f32 %v1157_v47, %v1159_v46 }
 0x8c1   : > { %v1156_v49 = vpop.xlane.xlu1 %1155 }
 0x8c2   : > { %v1163_v51 = vmax.f32 %v1161_v48, 0.0  ;;  %v1158_v52 = vmul.f32 0.03125, %v1156_v49 }
 0x8c4   : > { %v1167_v53 = vadd.f32 1e-05, %v1163_v51  ;;  %v1162_v54 = vsub.f32 %v1158_v52, %v1160_v50 }
 0x8c6   : > { %1734 = vrsqrt.f32 %v1167_v53  ;;  %v1164_v55 = vmax.f32 %v1162_v54, 0.0 }
 0x8c8   : > { %v1168_v56 = vadd.f32 1e-05, %v1164_v55 }
 0x8ca   : > { %1736 = vrsqrt.f32 %v1168_v56 }
 0x8d0   : > { %v1735_v60 = vpop.eup %1734 }
 0x8d1   : > { %v1171_v61 = vmul.f32 %v1735_v60, %v1165_v59 }
 0x8d3   : > { %v1177_v17 = vmul.f32 %v1176_v58, %v1171_v61 }
 0x8d4   : > { %v1737_v63 = vpop.eup %1736 }
 0x8d5   : > { %v1183_v0 = vadd.f32 %v1182_v20, %v1177_v17  ;;  %v1172_v1 = vmul.f32 %v1737_v63, %v1166_v62  ;;  %1190 = sbr.rel (%p1485_p1) target bundleno = 2446 (0x98e), region = 64 }
 0x8d7   : > { %1185 = vst.msk [vmem:[#allocation2] sm:$0xff] %vm523_vm2, %v1183_v0  ;;  %v1178_v2 = vmul.f32 %v1176_v58, %v1172_v1 }
 0x8d9   : > { %v1184_v3 = vadd.f32 %v1182_v20, %v1178_v2 }
 0x8db   : > { %1186 = vst.msk [vmem:[#allocation2 + $0x8] sm:$0xff] %vm523_vm2, %v1184_v3 }
 0x8de   : > { %v1191_v4 = vld [vmem:[#allocation2] sm:$0xff] }
 0x8df   : > { %v1193_v12 = vsel %vm523_vm2, %v1191_v4, 0.0  ;;  %v1201_v14 = vmul.f32 %v1191_v4, %v1191_v4 }
 0x8e0   : > { %1194 = vadd.xlane.f32.xlu0 %v1193_v12 }
 0x8e1   : > { %v1203_v6 = vsel %vm523_vm2, %v1201_v14, 0.0 }
 0x8e2   : > { %v1192_v5 = vld [vmem:[#allocation2 + $0x8] sm:$0xff]  ;;  %1204 = vadd.xlane.f32.xlu1 %v1203_v6 }
 0x8e3   : > { %v1202_v23 = vmul.f32 %v1192_v5, %v1192_v5  ;;  %v1196_v30 = vsel %vm523_vm2, %v1192_v5, 0.0 }
 0x8e4   : > { %1197 = vadd.xlane.f32.xlu0 %v1196_v30 }
 0x8e5   : > { %v1206_v7 = vsel %vm523_vm2, %v1202_v23, 0.0 }
 0x8e6   : > { %1207 = vadd.xlane.f32.xlu1 %v1206_v7 }
 0x96d   : > { %v1195_v9 = vpop.xlane.xlu0 %1194 }
 0x96e   : > { %v1199_v25 = vmul.f32 0.03125, %v1195_v9 }
 0x96f   : > { %v1205_v15 = vpop.xlane.xlu1 %1204 }
 0x970   : > { %v1211_v16 = vmul.f32 %v1199_v25, %v1199_v25  ;;  %v1209_v21 = vmul.f32 0.03125, %v1205_v15  ;;  %v1217_v37 = vsub.f32 %v1191_v4, %v1199_v25 }
 0x971   : > { %v1198_v19 = vpop.xlane.xlu0 %1197 }
 0x972   : > { %v1213_v22 = vsub.f32 %v1209_v21, %v1211_v16  ;;  %v1200_v24 = vmul.f32 0.03125, %v1198_v19 }
 0x973   : > { %v1208_v26 = vpop.xlane.xlu1 %1207 }
 0x974   : > { %v1215_v27 = vmax.f32 %v1213_v22, 0.0  ;;  %v1212_v28 = vmul.f32 %v1200_v24, %v1200_v24  ;;  %v1210_v8 = vmul.f32 0.03125, %v1208_v26  ;;  %v1218_v43 = vsub.f32 %v1192_v5, %v1200_v24 }
 0x976   : > { %v1219_v29 = vadd.f32 1e-05, %v1215_v27  ;;  %v1214_v31 = vsub.f32 %v1210_v8, %v1212_v28 }
 0x978   : > { %1738 = vrsqrt.f32 %v1219_v29  ;;  %v1216_v32 = vmax.f32 %v1214_v31, 0.0 }
 0x97a   : > { %v1220_v34 = vadd.f32 1e-05, %v1216_v32 }
 0x97c   : > { %1740 = vrsqrt.f32 %v1220_v34 }
 0x982   : > { %v1739_v41 = vpop.eup %1738 }
 0x983   : > { %v1223_v42 = vmul.f32 %v1739_v41, %v1217_v37 }
 0x985   : > { %v1237_v13 = vmul.f32 %v1232_v38, %v1223_v42 }
 0x986   : > { %v1741_v44 = vpop.eup %1740 }
 0x987   : > { %v1249_v45 = vadd.f32 %v1486_v10, %v1237_v13  ;;  %v1224_v46 = vmul.f32 %v1741_v44, %v1218_v43 }
 0x989   : > { %1251 = vst.msk [vmem:[%s2222_s10] sm:$0xff] %vm523_vm2, %v1249_v45  ;;  %v1238_v47 = vmul.f32 %v1236_v11, %v1224_v46 }
 0x98b   : > { %v1250_v48 = vadd.f32 %v1487_v40, %v1238_v47 }
 0x98d   : > { %1252 = vst.msk [vmem:[%s2222_s10 + $0x8] sm:$0xff] %vm523_vm2, %v1250_v48 }
 0x98e PF: > { %s1498_s24 = sshll.u32 %s1916_s8, 8  ;;  %s1267_s16 = sshll.u32 %s2222_s10, 4  ;;  %s2434_s16 = int_to_ptr.vmem [resolvable:$true] %s1267_s16 }
 0x98f   : > { %s2431_s26 = scalar_lea.hbm %s2506_s7, %s1498_s24  ;;  %s2557_s3 = sand.u32 1, %s1892_s25  }
 0x990   : > { %s2438_s15 = scalar_lea.sflag [#allocation5], %s2557_s3  ;;  %s1802_s18 = scalar_lea.vmem %s2434_s16, 256 }
 0x991   : > { %p1803_p10 = scmp.ne.s32.totalorder %s2434_s16, %s1802_s18  ;;  %p2558_p11 = scmp.ne.s32.totalorder %s2539_s27, 0 }
 0x992   : > { %s1939_s8 = smov [#allocation8]  }
 0x993   : > { %p1804_p12 = pnand %p1803_p10, %p2558_p11  ;;  %s1806_s23 = sshll.u32 %s1939_s8, 4  ;;  %s1807_s23 = int_to_ptr.vmem [resolvable:$false] %s1806_s23 }
 0x994   : > { %s1808_s12 = scalar_lea.vmem %s1807_s23, 512  ;;  %p1809_p13 = scmp.lt.s32.totalorder %s2434_s16, %s1807_s23 }
 0x995   : > { %p1805_p2 = pneg %p1804_p12  ;;  %p1810_p0 = scmp.lt.s32.totalorder %s1808_s12, %s1802_s18 }
 0x997   : > { %p1811_p5 = por %p1810_p0, %p1809_p13 }
 0x999   : > { %p1812_p7 = pnand %p1811_p5, %p1805_p2 }
 0x99b   : > { %1815 = shalt.err (!%p1812_p7)
}
 0x99c   : > { %s1816_s20 = scalar_lea.hbm %s2431_s26, 256  ;;  %s1820_s22 = scalar_lea.hbm %s2506_s7, 512 }
 0x99d   : > { %p1817_p3 = scmp.ne.s32.totalorder %s2431_s26, %s1816_s20  ;;  %p1821_p6 = scmp.lt.u32.totalorder %s2431_s26, %s2506_s7 }
 0x99e   : > { %p1822_p9 = scmp.lt.u32.totalorder %s1820_s22, %s1816_s20  ;;  %p1824_p10 = scmp.lt.u32.totalorder %s1816_s20, %s2431_s26 }
 0x99f   : > { %p1818_p8 = pnand %p1817_p3, %p2558_p11 }
 0x9a0   : > { %p1823_p1 = por %p1822_p9, %p1821_p6 }
 0x9a1   : > { %p1819_p4 = pneg %p1818_p8 }
 0x9a2   : > { %p1825_p12 = por %p1824_p10, %p1823_p1 }
 0x9a4   : > { %p1826_p2 = pnand %p1825_p12, %p1819_p4 }
 0x9a6   : > { %1829 = shalt.err (!%p1826_p2)
}
 0x9a7   : > { %s1940_s17 = smov 128   ;;  %s1941_s29 = smov 8  }
 0x9a8   : > { %1578 = dma.vmem_to_hbm [thread:$0]  (%p2558_p11), %s2434_s16, 256, %s2431_s26, %s2438_s15, %s1940_s17, %s1940_s17, %s1941_s29  }
 0x9a9 PF: > { %s2559_s10 = sld [smem:[#allocation18_spill]]  ;;  %s2560_s4 = sld [smem:[#allocation12_spill]] }
 0x9aa   : > { %s2561_s28 = sld [smem:[#allocation23_spill]] }
 0x9af   : > { %p1592_p13 = scmp.ge.s32.totalorder %s2559_s10, 2  ;;  %s1282_s9 = sand.u32 1, %s2560_s4  }
 0x9b0   : > { %p2562_p0 = scmp.ne.s32.totalorder %s2561_s28, 0  ;;  %s1283_s24 = scalar_lea.sflag [#allocation5], %s1282_s9 }
 0x9b2   : > { %p1588_p5 = pnand %p1592_p13, %p2562_p0 }
 0x9b4   : > { %1883 = dma.done.wait (!%p1588_p5), %s1283_s24, 256  }
 0x9b5   : > { %1885 = vsyncadd (!%p1588_p5), %s1283_s24, 4294967040  ;;  %s26_s11 = sadd.s32 1, %s2559_s10   ;;  %s2563_s30 = sld [smem:[#allocation13_spill]] }
 0x9b6   : > { %p23_p7 = scmp.ge.s32.totalorder %s26_s11, 6   ;;  %s2564_s26 = sld [smem:[#allocation22_spill]] }
 0x9b7   : > { %s2565_s27 = sld [smem:[#allocation14_spill]]  ;;  %s2566_s28 = sld [smem:[#allocation15_spill]] }
 0x9b8   : > { %s2567_s29 = sld [smem:[#allocation21_spill]]  ;;  %s2568_s16 = sld [smem:[#allocation16_spill]] }
 0x9b9   : > { %s2569_s8 = sld [smem:[#allocation17_spill]]  ;;  %s2570_s9 = sld [smem:[#allocation19_spill]] }
 0x9ba   : > { %s2571_s10 = sld [smem:[#allocation20_spill]]  ;;  %s2572_s24 = smov %s1892_s25 }
 0x9bb   : > { %s2573_s25 = smov %s2563_s30  ;;  %25 = sbr.rel (!%p23_p7) target bundleno = 14 (0xe), region = 129 }
 0x9be   : > { %s2574_s30 = smov %s2568_s16 }
 0x9c2   :  { %1288 = vsyncpa [#allocation4], 1 }
 0x9c3   :  { %1290 = vsyncpa [#allocation4 + $0x1], 1 }
 0x9c4   :  { %1291 = vsyncpa [#allocation7], 1 }
 0x9c5   :  { %1293 = vsyncpa [#allocation7 + $0x1], 1 }
 0x9c6   :  { %1294 = vsyncpa [#allocation5], 1 }
 0x9c7   :  { %1296 = vsyncpa [#allocation5 + $0x1], 1 }

</bundles_post_ra>
